<compile_context>
chip_gen: v5e
topology: v5e:2x2
jax: 0.10.0
libtpu: 0.0.40
codegen_flags: <defaults>
</compile_context>

<pallas_src>
import functools

import jax
import jax.numpy as jnp
from jax.experimental import pallas as pl
from jax.experimental.pallas import tpu as pltpu

LANES = 128          # pad output channels to this for lane-dense stores
NEG_SLOPE = 0.2
BN_EPS = 1e-5


def _round_up(x, m):
    return ((x + m - 1) // m) * m


@functools.lru_cache(maxsize=None)
def _vmem_limit_bytes():
    """Tight cap on v7x (64 MiB physical VMEM), generous on v5e/v6e (128 MiB)."""
    try:
        cap = pltpu.get_tpu_info().vmem_capacity_bytes
    except Exception:
        cap = 64 * 1024 * 1024          # conservative fallback (safe on every chip)
    return int(min(cap * 3 // 4, 100 * 1024 * 1024))


def _pick_tile(m, tm_max=512):
    """Largest multiple-of-8 divisor of m with tm <= tm_max and nt >= 2.

    Keeps the grid >= 2 steps so v7x megacore has work to shard and the patch
    DMAs are double-buffered; falls back to a single whole-M tile only when m
    is too small to split."""
    target = min(tm_max, m // 2)
    best = 0
    t = 8
    while t <= target:
        if m % t == 0:
            best = t
        t += 8
    return best if best > 0 else m


def _const_block_spec(shape):
    """Grid-invariant operand (constant index_map): single-buffer it when the
    installed JAX supports pipeline_mode, so no useless second VMEM copy."""
    idx = lambda i: (0, 0)
    try:
        return pl.BlockSpec(shape, idx, pipeline_mode=pl.Buffered(1))
    except TypeError:                    # older BlockSpec without pipeline_mode
        return pl.BlockSpec(shape, idx)


# ----------------------------- Pallas kernel -----------------------------

def _conv_stats_kernel(p_ref, w_ref, out_ref, psum_ref, psq_ref):
    """MXU matmul of (already activated) bf16 patches with the conv weight matrix.

    Writes the raw conv tile in bf16 (lane-dense, Cp = multiple of 128) plus the
    per-channel partial sum / sum-of-squares taken from the f32 accumulator,
    i.e. the statistics this layer's BatchNorm needs — so each activation hits
    HBM exactly once and no separate stats pass exists."""
    acc = jnp.dot(p_ref[...], w_ref[...], preferred_element_type=jnp.float32)  # (TM, Cp) f32
    out_ref[...] = acc.astype(out_ref.dtype)                                   # bf16 store
    s = jnp.sum(acc, axis=0, keepdims=True)                                    # (1, Cp)
    sq = jnp.sum(acc * acc, axis=0, keepdims=True)
    psum_ref[...] = jnp.broadcast_to(s, psum_ref.shape)                        # (1, 8, Cp)
    psq_ref[...] = jnp.broadcast_to(sq, psq_ref.shape)


def conv_matmul(patches, w_mat, *, tm_max=512):
    """pallas_call wrapper: (M, K) bf16 patches @ (K, Cp) bf16 weights.
    Returns ((M, Cp) bf16 conv output, per-channel sum, per-channel sum-of-squares)."""
    m, k = patches.shape
    cp = w_mat.shape[1]
    tm = _pick_tile(m, tm_max)
    nt = m // tm

    out, psum, psq = pl.pallas_call(
        _conv_stats_kernel,
        grid=(nt,),
        out_shape=(jax.ShapeDtypeStruct((m, cp), jnp.bfloat16),
                   jax.ShapeDtypeStruct((nt, 8, cp), jnp.float32),
                   jax.ShapeDtypeStruct((nt, 8, cp), jnp.float32)),
        in_specs=[pl.BlockSpec((tm, k), lambda i: (i, 0)),   # patch tile (pipelined)
                  _const_block_spec((k, cp))],                # weights: DMA'd once
        out_specs=(pl.BlockSpec((tm, cp), lambda i: (i, 0)),
                   pl.BlockSpec((1, 8, cp), lambda i: (i, 0, 0)),
                   pl.BlockSpec((1, 8, cp), lambda i: (i, 0, 0))),
        compiler_params=pltpu.CompilerParams(
            dimension_semantics=("parallel",),                # v7x: shard M over 2 TCs
            vmem_limit_bytes=_vmem_limit_bytes()),
    )(patches, w_mat)

    # tiny cross-tile reduce of the per-tile partial stats (sublanes are replicas)
    s = jnp.sum(psum[:, 0, :], axis=0)
    sq = jnp.sum(psq[:, 0, :], axis=0)
    return out, s, sq


# ----------------------------- JAX glue -----------------------------

def act_im2col(x, kh, kw, stride, pad, scale=None, shift=None, leaky=False):
    """Apply the previous layer's folded BatchNorm affine and LeakyReLU(0.2),
    pad spatially with true zeros (PyTorch pads the post-activation tensor),
    then extract kh x kw stride-`stride` patches -> ((N*Ho*Wo, kh*kw*C) bf16, Ho, Wo).

    The affine / LeakyReLU / slice are fused by XLA into the patch-extraction
    pass, so they add no HBM traffic.
    # TODO(synk): move patch extraction into the Pallas kernel (haloed NHWC tile
    # DMA'd once + 16-tap strided-slice accumulation) to avoid materializing the
    # 4x-redundant patch array in HBM; kept in XLA here for robustness at the
    # small channel counts of this model."""
    x = x.astype(jnp.float32)
    if scale is not None:
        x = x * scale + shift                       # per-channel (C,) folded BN
    if leaky:
        x = jnp.where(x >= 0, x, NEG_SLOPE * x)
    x = x.astype(jnp.bfloat16)                      # bf16 into the MXU
    if pad:
        x = jnp.pad(x, ((0, 0), (pad, pad), (pad, pad), (0, 0)))
    n, h, w, c = x.shape
    ho = (h - kh) // stride + 1
    wo = (w - kw) // stride + 1
    cols = []
    for i in range(kh):
        for j in range(kw):
            cols.append(x[:, i:i + stride * ho:stride, j:j + stride * wo:stride, :])
    cols = jnp.stack(cols, axis=3)                  # (N, Ho, Wo, kh*kw, C)
    return cols.reshape(n * ho * wo, kh * kw * c), ho, wo


def prep_weight(w):
    """OIHW -> (kh*kw*cin, Cout_padded_to_128) bf16; column order matches act_im2col."""
    cout, cin, kh, kw = w.shape
    cout_p = _round_up(cout, LANES)
    wr = jnp.transpose(w, (2, 3, 1, 0))             # (kh, kw, cin, cout)
    wr = jnp.pad(wr, ((0, 0), (0, 0), (0, 0), (0, cout_p - cout)))
    return wr.reshape(kh * kw * cin, cout_p).astype(jnp.bfloat16)


def conv_layer(act, w, *, stride=2, pad=1, in_scale=None, in_shift=None, leaky=False):
    """One fused SN-conv layer.

    `act` is the previous layer's RAW conv output (NHWC, real channel count);
    its BN affine / LeakyReLU are folded into patch extraction.  Returns the raw
    NHWC conv output (bf16, real channels) and this layer's train-mode BatchNorm
    folded affine (gamma=1, beta=0, biased batch stats)."""
    n = act.shape[0]
    cout = w.shape[0]
    patches, ho, wo = act_im2col(act, 4, 4, stride, pad,
                                 scale=in_scale, shift=in_shift, leaky=leaky)
    m = patches.shape[0]
    out, s, sq = conv_matmul(patches, prep_weight(w))
    out = out.reshape(n, ho, wo, -1)[..., :cout]    # drop zero-padded channel lanes

    mean = s[:cout] / m
    var = jnp.maximum(sq[:cout] / m - mean * mean, 0.0)   # guard f32 cancellation
    inv = jax.lax.rsqrt(var + BN_EPS)
    return out, inv, -mean * inv


def spectral_normalize(w, iters=30):
    # TODO(synk): PyTorch spectral_norm runs ONE power-iteration step per forward with a
    # persistent random `u`; here the power iteration is run to (near) convergence once.
    mat = w.reshape(w.shape[0], -1)
    u0 = jnp.full((mat.shape[0],), 1.0, w.dtype) / jnp.sqrt(float(mat.shape[0]))

    def step(_, u):
        v = mat.T @ u
        v = v / (jnp.linalg.norm(v) + 1e-12)
        u = mat @ v
        return u / (jnp.linalg.norm(u) + 1e-12)

    u = jax.lax.fori_loop(0, iters, step, u0)
    v = mat.T @ u
    v = v / (jnp.linalg.norm(v) + 1e-12)
    sigma = u @ (mat @ v)
    return w / sigma


def init_params(key, nc=3, ndf=8):
    shapes = [(ndf, nc, 4, 4),
              (ndf * 2, ndf, 4, 4),
              (ndf * 4, ndf * 2, 4, 4),
              (ndf * 8, ndf * 4, 4, 4),
              (1, ndf * 8, 4, 4)]
    keys = jax.random.split(key, len(shapes))
    return [spectral_normalize(0.02 * jax.random.normal(k, s, jnp.float32))
            for k, s in zip(keys, shapes)]


def discriminator_forward(x_nchw, params):
    w1, w2, w3, w4, w5 = params
    x = jnp.transpose(x_nchw, (0, 2, 3, 1))          # NHWC once; no per-layer trips

    # layer 1: SN-conv(nc->ndf); its LeakyReLU is folded into layer 2's patch pass.
    a1, _, _ = conv_layer(x, w1)
    # layer 2: LeakyReLU(a1) -> SN-conv(ndf->2ndf); BN2 stats fused in the kernel.
    a2, sc2, sh2 = conv_layer(a1, w2, leaky=True)
    # layer 3: BN2 + LeakyReLU folded -> SN-conv(2ndf->4ndf); BN3 stats fused.
    a3, sc3, sh3 = conv_layer(a2, w3, in_scale=sc2, in_shift=sh2, leaky=True)
    # layer 4: BN3 + LeakyReLU folded -> SN-conv(4ndf->8ndf); BN4 stats fused.
    a4, sc4, sh4 = conv_layer(a3, w4, in_scale=sc3, in_shift=sh3, leaky=True)

    # head: BN4 + LeakyReLU + SN-conv(8ndf->1, 4x4 valid) on a tiny (N,4,4,C) tensor.
    y = a4.astype(jnp.float32) * sc4 + sh4
    y = jnp.where(y >= 0, y, NEG_SLOPE * y)
    return jnp.einsum('nijc,cij->n', y, w5[0])        # == main(x).view(-1); no Sigmoid


# ----------------------------- main -----------------------------

if __name__ == "__main__":
    key = jax.random.PRNGKey(0)
    k_x, k_p = jax.random.split(key)

    # small but structurally faithful: nc=3, ndf=8, 64x64 input (the final 4x4
    # valid conv requires a 64x64 input so it reduces to a single 1x1 output).
    nc, ndf, batch, hw = 3, 8, 2, 64
    x = jax.random.normal(k_x, (batch, nc, hw, hw), jnp.float32)
    params = init_params(k_p, nc=nc, ndf=ndf)

    fwd = jax.jit(discriminator_forward)
    out = jax.block_until_ready(fwd(x, params))

    assert out.shape == (batch,), out.shape
    assert bool(jnp.all(jnp.isfinite(out)))
    print("KERNEL_OK")
</pallas_src>

<mosaic_0001>
module attributes {stable_mosaic.version = 11 : i64} {
  func.func @_conv_stats_kernel(%arg0: i32, %arg1: memref<512x48xbf16, #tpu.memory_space<vmem>>, %arg2: memref<48x128xbf16, #tpu.memory_space<vmem>>, %arg3: memref<512x128xbf16, #tpu.memory_space<vmem>>, %arg4: memref<1x8x128xf32, #tpu.memory_space<vmem>>, %arg5: memref<1x8x128xf32, #tpu.memory_space<vmem>>) attributes {dimension_semantics = [#tpu.dimension_semantics<parallel>], iteration_bounds = array<i64: 4>, scalar_prefetch = 0 : i64, scratch_operands = 0 : i64, tpu.core_type = #tpu.core_type<tc>, window_params = [{transform_indices = @transform_0, window_bounds = array<i64: 512, 48>}, {pipeline_mode = #tpu.pipeline_mode<synchronous>, transform_indices = @transform_1, window_bounds = array<i64: 48, 128>}, {transform_indices = @transform_2, window_bounds = array<i64: 512, 128>}, {transform_indices = @transform_3, window_bounds = array<i64: 1, 8, 128>}, {transform_indices = @transform_4, window_bounds = array<i64: 1, 8, 128>}]} {
    %c0 = arith.constant 0 : index
    %c0_0 = arith.constant 0 : index
    %0 = vector.load %arg1[%c0, %c0_0] : memref<512x48xbf16, #tpu.memory_space<vmem>>, vector<512x48xbf16>
    %c0_1 = arith.constant 0 : index
    %c0_2 = arith.constant 0 : index
    %1 = vector.load %arg2[%c0_1, %c0_2] : memref<48x128xbf16, #tpu.memory_space<vmem>>, vector<48x128xbf16>
    %cst = arith.constant dense<0.000000e+00> : vector<512x128xf32>
    %2 = tpu.matmul %0, %1, %cst {dimension_numbers = #tpu.dot_dimension_numbers<[1], [0], [0], [1], [0, 0, 1, 1], [], []>} : vector<512x48xbf16>, vector<48x128xbf16>, vector<512x128xf32> -> vector<512x128xf32>
    %3 = arith.truncf %2 : vector<512x128xf32> to vector<512x128xbf16>
    %c0_3 = arith.constant 0 : index
    %c0_4 = arith.constant 0 : index
    %4 = vector.load %arg3[%c0_3, %c0_4] : memref<512x128xbf16, #tpu.memory_space<vmem>>, vector<512x128xbf16>
    tpu.vector_store %arg3[%c0_3, %c0_4], %3 {strides = array<i32>} : memref<512x128xbf16, #tpu.memory_space<vmem>>, vector<512x128xbf16>,
    %cst_5 = arith.constant dense<0.000000e+00> : vector<128xf32>
    %5 = vector.multi_reduction <add>, %2, %cst_5 [0] : vector<512x128xf32> to vector<128xf32>
    %6 = vector.shape_cast %5 : vector<128xf32> to vector<1x128xf32>
    %7 = arith.mulf %2, %2 : vector<512x128xf32>
    %cst_6 = arith.constant dense<0.000000e+00> : vector<128xf32>
    %8 = vector.multi_reduction <add>, %7, %cst_6 [0] : vector<512x128xf32> to vector<128xf32>
    %9 = vector.shape_cast %8 : vector<128xf32> to vector<1x128xf32>
    %10 = vector.shape_cast %6 : vector<1x128xf32> to vector<1x1x128xf32>
    %11 = vector.broadcast %10 : vector<1x1x128xf32> to vector<1x8x128xf32>
    %c0_7 = arith.constant 0 : index
    %c0_8 = arith.constant 0 : index
    %c0_9 = arith.constant 0 : index
    %12 = vector.load %arg4[%c0_7, %c0_8, %c0_9] : memref<1x8x128xf32, #tpu.memory_space<vmem>>, vector<1x8x128xf32>
    tpu.vector_store %arg4[%c0_7, %c0_8, %c0_9], %11 {strides = array<i32>} : memref<1x8x128xf32, #tpu.memory_space<vmem>>, vector<1x8x128xf32>,
    %13 = vector.shape_cast %9 : vector<1x128xf32> to vector<1x1x128xf32>
    %14 = vector.broadcast %13 : vector<1x1x128xf32> to vector<1x8x128xf32>
    %c0_10 = arith.constant 0 : index
    %c0_11 = arith.constant 0 : index
    %c0_12 = arith.constant 0 : index
    %15 = vector.load %arg5[%c0_10, %c0_11, %c0_12] : memref<1x8x128xf32, #tpu.memory_space<vmem>>, vector<1x8x128xf32>
    tpu.vector_store %arg5[%c0_10, %c0_11, %c0_12], %14 {strides = array<i32>} : memref<1x8x128xf32, #tpu.memory_space<vmem>>, vector<1x8x128xf32>,
    return
  }
  func.func @transform_0(%arg0: i32) -> (i32, i32) {
    %c0_i32 = arith.constant 0 : i32
    %c0_i32_0 = arith.constant 0 : i32
    return %arg0, %c0_i32 : i32, i32
  }
  func.func @transform_1(%arg0: i32) -> (i32, i32) {
    %c0_i32 = arith.constant 0 : i32
    %c0_i32_0 = arith.constant 0 : i32
    %c0_i32_1 = arith.constant 0 : i32
    return %c0_i32, %c0_i32_0 : i32, i32
  }
  func.func @transform_2(%arg0: i32) -> (i32, i32) {
    %c0_i32 = arith.constant 0 : i32
    %c0_i32_0 = arith.constant 0 : i32
    return %arg0, %c0_i32 : i32, i32
  }
  func.func @transform_3(%arg0: i32) -> (i32, i32, i32) {
    %c0_i32 = arith.constant 0 : i32
    %c0_i32_0 = arith.constant 0 : i32
    %c0_i32_1 = arith.constant 0 : i32
    return %arg0, %c0_i32, %c0_i32_0 : i32, i32, i32
  }
  func.func @transform_4(%arg0: i32) -> (i32, i32, i32) {
    %c0_i32 = arith.constant 0 : i32
    %c0_i32_0 = arith.constant 0 : i32
    %c0_i32_1 = arith.constant 0 : i32
    return %arg0, %c0_i32, %c0_i32_0 : i32, i32, i32
  }
}

module attributes {stable_mosaic.version = 11 : i64} {
  func.func @_conv_stats_kernel(%arg0: i32, %arg1: memref<256x128xbf16, #tpu.memory_space<vmem>>, %arg2: memref<128x128xbf16, #tpu.memory_space<vmem>>, %arg3: memref<256x128xbf16, #tpu.memory_space<vmem>>, %arg4: memref<1x8x128xf32, #tpu.memory_space<vmem>>, %arg5: memref<1x8x128xf32, #tpu.memory_space<vmem>>) attributes {dimension_semantics = [#tpu.dimension_semantics<parallel>], iteration_bounds = array<i64: 2>, scalar_prefetch = 0 : i64, scratch_operands = 0 : i64, tpu.core_type = #tpu.core_type<tc>, window_params = [{transform_indices = @transform_0, window_bounds = array<i64: 256, 128>}, {pipeline_mode = #tpu.pipeline_mode<synchronous>, transform_indices = @transform_1, window_bounds = array<i64: 128, 128>}, {transform_indices = @transform_2, window_bounds = array<i64: 256, 128>}, {transform_indices = @transform_3, window_bounds = array<i64: 1, 8, 128>}, {transform_indices = @transform_4, window_bounds = array<i64: 1, 8, 128>}]} {
    %c0 = arith.constant 0 : index
    %c0_0 = arith.constant 0 : index
    %0 = vector.load %arg1[%c0, %c0_0] : memref<256x128xbf16, #tpu.memory_space<vmem>>, vector<256x128xbf16>
    %c0_1 = arith.constant 0 : index
    %c0_2 = arith.constant 0 : index
    %1 = vector.load %arg2[%c0_1, %c0_2] : memref<128x128xbf16, #tpu.memory_space<vmem>>, vector<128x128xbf16>
    %cst = arith.constant dense<0.000000e+00> : vector<256x128xf32>
    %2 = tpu.matmul %0, %1, %cst {dimension_numbers = #tpu.dot_dimension_numbers<[1], [0], [0], [1], [0, 0, 1, 1], [], []>} : vector<256x128xbf16>, vector<128x128xbf16>, vector<256x128xf32> -> vector<256x128xf32>
    %3 = arith.truncf %2 : vector<256x128xf32> to vector<256x128xbf16>
    %c0_3 = arith.constant 0 : index
    %c0_4 = arith.constant 0 : index
    %4 = vector.load %arg3[%c0_3, %c0_4] : memref<256x128xbf16, #tpu.memory_space<vmem>>, vector<256x128xbf16>
    tpu.vector_store %arg3[%c0_3, %c0_4], %3 {strides = array<i32>} : memref<256x128xbf16, #tpu.memory_space<vmem>>, vector<256x128xbf16>,
    %cst_5 = arith.constant dense<0.000000e+00> : vector<128xf32>
    %5 = vector.multi_reduction <add>, %2, %cst_5 [0] : vector<256x128xf32> to vector<128xf32>
    %6 = vector.shape_cast %5 : vector<128xf32> to vector<1x128xf32>
    %7 = arith.mulf %2, %2 : vector<256x128xf32>
    %cst_6 = arith.constant dense<0.000000e+00> : vector<128xf32>
    %8 = vector.multi_reduction <add>, %7, %cst_6 [0] : vector<256x128xf32> to vector<128xf32>
    %9 = vector.shape_cast %8 : vector<128xf32> to vector<1x128xf32>
    %10 = vector.shape_cast %6 : vector<1x128xf32> to vector<1x1x128xf32>
    %11 = vector.broadcast %10 : vector<1x1x128xf32> to vector<1x8x128xf32>
    %c0_7 = arith.constant 0 : index
    %c0_8 = arith.constant 0 : index
    %c0_9 = arith.constant 0 : index
    %12 = vector.load %arg4[%c0_7, %c0_8, %c0_9] : memref<1x8x128xf32, #tpu.memory_space<vmem>>, vector<1x8x128xf32>
    tpu.vector_store %arg4[%c0_7, %c0_8, %c0_9], %11 {strides = array<i32>} : memref<1x8x128xf32, #tpu.memory_space<vmem>>, vector<1x8x128xf32>,
    %13 = vector.shape_cast %9 : vector<1x128xf32> to vector<1x1x128xf32>
    %14 = vector.broadcast %13 : vector<1x1x128xf32> to vector<1x8x128xf32>
    %c0_10 = arith.constant 0 : index
    %c0_11 = arith.constant 0 : index
    %c0_12 = arith.constant 0 : index
    %15 = vector.load %arg5[%c0_10, %c0_11, %c0_12] : memref<1x8x128xf32, #tpu.memory_space<vmem>>, vector<1x8x128xf32>
    tpu.vector_store %arg5[%c0_10, %c0_11, %c0_12], %14 {strides = array<i32>} : memref<1x8x128xf32, #tpu.memory_space<vmem>>, vector<1x8x128xf32>,
    return
  }
  func.func @transform_0(%arg0: i32) -> (i32, i32) {
    %c0_i32 = arith.constant 0 : i32
    %c0_i32_0 = arith.constant 0 : i32
    return %arg0, %c0_i32 : i32, i32
  }
  func.func @transform_1(%arg0: i32) -> (i32, i32) {
    %c0_i32 = arith.constant 0 : i32
    %c0_i32_0 = arith.constant 0 : i32
    %c0_i32_1 = arith.constant 0 : i32
    return %c0_i32, %c0_i32_0 : i32, i32
  }
  func.func @transform_2(%arg0: i32) -> (i32, i32) {
    %c0_i32 = arith.constant 0 : i32
    %c0_i32_0 = arith.constant 0 : i32
    return %arg0, %c0_i32 : i32, i32
  }
  func.func @transform_3(%arg0: i32) -> (i32, i32, i32) {
    %c0_i32 = arith.constant 0 : i32
    %c0_i32_0 = arith.constant 0 : i32
    %c0_i32_1 = arith.constant 0 : i32
    return %arg0, %c0_i32, %c0_i32_0 : i32, i32, i32
  }
  func.func @transform_4(%arg0: i32) -> (i32, i32, i32) {
    %c0_i32 = arith.constant 0 : i32
    %c0_i32_0 = arith.constant 0 : i32
    %c0_i32_1 = arith.constant 0 : i32
    return %arg0, %c0_i32, %c0_i32_0 : i32, i32, i32
  }
}

module attributes {stable_mosaic.version = 11 : i64} {
  func.func @_conv_stats_kernel(%arg0: i32, %arg1: memref<64x256xbf16, #tpu.memory_space<vmem>>, %arg2: memref<256x128xbf16, #tpu.memory_space<vmem>>, %arg3: memref<64x128xbf16, #tpu.memory_space<vmem>>, %arg4: memref<1x8x128xf32, #tpu.memory_space<vmem>>, %arg5: memref<1x8x128xf32, #tpu.memory_space<vmem>>) attributes {dimension_semantics = [#tpu.dimension_semantics<parallel>], iteration_bounds = array<i64: 2>, scalar_prefetch = 0 : i64, scratch_operands = 0 : i64, tpu.core_type = #tpu.core_type<tc>, window_params = [{transform_indices = @transform_0, window_bounds = array<i64: 64, 256>}, {pipeline_mode = #tpu.pipeline_mode<synchronous>, transform_indices = @transform_1, window_bounds = array<i64: 256, 128>}, {transform_indices = @transform_2, window_bounds = array<i64: 64, 128>}, {transform_indices = @transform_3, window_bounds = array<i64: 1, 8, 128>}, {transform_indices = @transform_4, window_bounds = array<i64: 1, 8, 128>}]} {
    %c0 = arith.constant 0 : index
    %c0_0 = arith.constant 0 : index
    %0 = vector.load %arg1[%c0, %c0_0] : memref<64x256xbf16, #tpu.memory_space<vmem>>, vector<64x256xbf16>
    %c0_1 = arith.constant 0 : index
    %c0_2 = arith.constant 0 : index
    %1 = vector.load %arg2[%c0_1, %c0_2] : memref<256x128xbf16, #tpu.memory_space<vmem>>, vector<256x128xbf16>
    %cst = arith.constant dense<0.000000e+00> : vector<64x128xf32>
    %2 = tpu.matmul %0, %1, %cst {dimension_numbers = #tpu.dot_dimension_numbers<[1], [0], [0], [1], [0, 0, 1, 1], [], []>} : vector<64x256xbf16>, vector<256x128xbf16>, vector<64x128xf32> -> vector<64x128xf32>
    %3 = arith.truncf %2 : vector<64x128xf32> to vector<64x128xbf16>
    %c0_3 = arith.constant 0 : index
    %c0_4 = arith.constant 0 : index
    %4 = vector.load %arg3[%c0_3, %c0_4] : memref<64x128xbf16, #tpu.memory_space<vmem>>, vector<64x128xbf16>
    tpu.vector_store %arg3[%c0_3, %c0_4], %3 {strides = array<i32>} : memref<64x128xbf16, #tpu.memory_space<vmem>>, vector<64x128xbf16>,
    %cst_5 = arith.constant dense<0.000000e+00> : vector<128xf32>
    %5 = vector.multi_reduction <add>, %2, %cst_5 [0] : vector<64x128xf32> to vector<128xf32>
    %6 = vector.shape_cast %5 : vector<128xf32> to vector<1x128xf32>
    %7 = arith.mulf %2, %2 : vector<64x128xf32>
    %cst_6 = arith.constant dense<0.000000e+00> : vector<128xf32>
    %8 = vector.multi_reduction <add>, %7, %cst_6 [0] : vector<64x128xf32> to vector<128xf32>
    %9 = vector.shape_cast %8 : vector<128xf32> to vector<1x128xf32>
    %10 = vector.shape_cast %6 : vector<1x128xf32> to vector<1x1x128xf32>
    %11 = vector.broadcast %10 : vector<1x1x128xf32> to vector<1x8x128xf32>
    %c0_7 = arith.constant 0 : index
    %c0_8 = arith.constant 0 : index
    %c0_9 = arith.constant 0 : index
    %12 = vector.load %arg4[%c0_7, %c0_8, %c0_9] : memref<1x8x128xf32, #tpu.memory_space<vmem>>, vector<1x8x128xf32>
    tpu.vector_store %arg4[%c0_7, %c0_8, %c0_9], %11 {strides = array<i32>} : memref<1x8x128xf32, #tpu.memory_space<vmem>>, vector<1x8x128xf32>,
    %13 = vector.shape_cast %9 : vector<1x128xf32> to vector<1x1x128xf32>
    %14 = vector.broadcast %13 : vector<1x1x128xf32> to vector<1x8x128xf32>
    %c0_10 = arith.constant 0 : index
    %c0_11 = arith.constant 0 : index
    %c0_12 = arith.constant 0 : index
    %15 = vector.load %arg5[%c0_10, %c0_11, %c0_12] : memref<1x8x128xf32, #tpu.memory_space<vmem>>, vector<1x8x128xf32>
    tpu.vector_store %arg5[%c0_10, %c0_11, %c0_12], %14 {strides = array<i32>} : memref<1x8x128xf32, #tpu.memory_space<vmem>>, vector<1x8x128xf32>,
    return
  }
  func.func @transform_0(%arg0: i32) -> (i32, i32) {
    %c0_i32 = arith.constant 0 : i32
    %c0_i32_0 = arith.constant 0 : i32
    return %arg0, %c0_i32 : i32, i32
  }
  func.func @transform_1(%arg0: i32) -> (i32, i32) {
    %c0_i32 = arith.constant 0 : i32
    %c0_i32_0 = arith.constant 0 : i32
    %c0_i32_1 = arith.constant 0 : i32
    return %c0_i32, %c0_i32_0 : i32, i32
  }
  func.func @transform_2(%arg0: i32) -> (i32, i32) {
    %c0_i32 = arith.constant 0 : i32
    %c0_i32_0 = arith.constant 0 : i32
    return %arg0, %c0_i32 : i32, i32
  }
  func.func @transform_3(%arg0: i32) -> (i32, i32, i32) {
    %c0_i32 = arith.constant 0 : i32
    %c0_i32_0 = arith.constant 0 : i32
    %c0_i32_1 = arith.constant 0 : i32
    return %arg0, %c0_i32, %c0_i32_0 : i32, i32, i32
  }
  func.func @transform_4(%arg0: i32) -> (i32, i32, i32) {
    %c0_i32 = arith.constant 0 : i32
    %c0_i32_0 = arith.constant 0 : i32
    %c0_i32_1 = arith.constant 0 : i32
    return %arg0, %c0_i32, %c0_i32_0 : i32, i32, i32
  }
}

module attributes {stable_mosaic.version = 11 : i64} {
  func.func @_conv_stats_kernel(%arg0: i32, %arg1: memref<16x512xbf16, #tpu.memory_space<vmem>>, %arg2: memref<512x128xbf16, #tpu.memory_space<vmem>>, %arg3: memref<16x128xbf16, #tpu.memory_space<vmem>>, %arg4: memref<1x8x128xf32, #tpu.memory_space<vmem>>, %arg5: memref<1x8x128xf32, #tpu.memory_space<vmem>>) attributes {dimension_semantics = [#tpu.dimension_semantics<parallel>], iteration_bounds = array<i64: 2>, scalar_prefetch = 0 : i64, scratch_operands = 0 : i64, tpu.core_type = #tpu.core_type<tc>, window_params = [{transform_indices = @transform_0, window_bounds = array<i64: 16, 512>}, {pipeline_mode = #tpu.pipeline_mode<synchronous>, transform_indices = @transform_1, window_bounds = array<i64: 512, 128>}, {transform_indices = @transform_2, window_bounds = array<i64: 16, 128>}, {transform_indices = @transform_3, window_bounds = array<i64: 1, 8, 128>}, {transform_indices = @transform_4, window_bounds = array<i64: 1, 8, 128>}]} {
    %c0 = arith.constant 0 : index
    %c0_0 = arith.constant 0 : index
    %0 = vector.load %arg1[%c0, %c0_0] : memref<16x512xbf16, #tpu.memory_space<vmem>>, vector<16x512xbf16>
    %c0_1 = arith.constant 0 : index
    %c0_2 = arith.constant 0 : index
    %1 = vector.load %arg2[%c0_1, %c0_2] : memref<512x128xbf16, #tpu.memory_space<vmem>>, vector<512x128xbf16>
    %cst = arith.constant dense<0.000000e+00> : vector<16x128xf32>
    %2 = tpu.matmul %0, %1, %cst {dimension_numbers = #tpu.dot_dimension_numbers<[1], [0], [0], [1], [0, 0, 1, 1], [], []>} : vector<16x512xbf16>, vector<512x128xbf16>, vector<16x128xf32> -> vector<16x128xf32>
    %3 = arith.truncf %2 : vector<16x128xf32> to vector<16x128xbf16>
    %c0_3 = arith.constant 0 : index
    %c0_4 = arith.constant 0 : index
    %4 = vector.load %arg3[%c0_3, %c0_4] : memref<16x128xbf16, #tpu.memory_space<vmem>>, vector<16x128xbf16>
    tpu.vector_store %arg3[%c0_3, %c0_4], %3 {strides = array<i32>} : memref<16x128xbf16, #tpu.memory_space<vmem>>, vector<16x128xbf16>,
    %cst_5 = arith.constant dense<0.000000e+00> : vector<128xf32>
    %5 = vector.multi_reduction <add>, %2, %cst_5 [0] : vector<16x128xf32> to vector<128xf32>
    %6 = vector.shape_cast %5 : vector<128xf32> to vector<1x128xf32>
    %7 = arith.mulf %2, %2 : vector<16x128xf32>
    %cst_6 = arith.constant dense<0.000000e+00> : vector<128xf32>
    %8 = vector.multi_reduction <add>, %7, %cst_6 [0] : vector<16x128xf32> to vector<128xf32>
    %9 = vector.shape_cast %8 : vector<128xf32> to vector<1x128xf32>
    %10 = vector.shape_cast %6 : vector<1x128xf32> to vector<1x1x128xf32>
    %11 = vector.broadcast %10 : vector<1x1x128xf32> to vector<1x8x128xf32>
    %c0_7 = arith.constant 0 : index
    %c0_8 = arith.constant 0 : index
    %c0_9 = arith.constant 0 : index
    %12 = vector.load %arg4[%c0_7, %c0_8, %c0_9] : memref<1x8x128xf32, #tpu.memory_space<vmem>>, vector<1x8x128xf32>
    tpu.vector_store %arg4[%c0_7, %c0_8, %c0_9], %11 {strides = array<i32>} : memref<1x8x128xf32, #tpu.memory_space<vmem>>, vector<1x8x128xf32>,
    %13 = vector.shape_cast %9 : vector<1x128xf32> to vector<1x1x128xf32>
    %14 = vector.broadcast %13 : vector<1x1x128xf32> to vector<1x8x128xf32>
    %c0_10 = arith.constant 0 : index
    %c0_11 = arith.constant 0 : index
    %c0_12 = arith.constant 0 : index
    %15 = vector.load %arg5[%c0_10, %c0_11, %c0_12] : memref<1x8x128xf32, #tpu.memory_space<vmem>>, vector<1x8x128xf32>
    tpu.vector_store %arg5[%c0_10, %c0_11, %c0_12], %14 {strides = array<i32>} : memref<1x8x128xf32, #tpu.memory_space<vmem>>, vector<1x8x128xf32>,
    return
  }
  func.func @transform_0(%arg0: i32) -> (i32, i32) {
    %c0_i32 = arith.constant 0 : i32
    %c0_i32_0 = arith.constant 0 : i32
    return %arg0, %c0_i32 : i32, i32
  }
  func.func @transform_1(%arg0: i32) -> (i32, i32) {
    %c0_i32 = arith.constant 0 : i32
    %c0_i32_0 = arith.constant 0 : i32
    %c0_i32_1 = arith.constant 0 : i32
    return %c0_i32, %c0_i32_0 : i32, i32
  }
  func.func @transform_2(%arg0: i32) -> (i32, i32) {
    %c0_i32 = arith.constant 0 : i32
    %c0_i32_0 = arith.constant 0 : i32
    return %arg0, %c0_i32 : i32, i32
  }
  func.func @transform_3(%arg0: i32) -> (i32, i32, i32) {
    %c0_i32 = arith.constant 0 : i32
    %c0_i32_0 = arith.constant 0 : i32
    %c0_i32_1 = arith.constant 0 : i32
    return %arg0, %c0_i32, %c0_i32_0 : i32, i32, i32
  }
  func.func @transform_4(%arg0: i32) -> (i32, i32, i32) {
    %c0_i32 = arith.constant 0 : i32
    %c0_i32_0 = arith.constant 0 : i32
    %c0_i32_1 = arith.constant 0 : i32
    return %arg0, %c0_i32, %c0_i32_0 : i32, i32, i32
  }
}

</mosaic_0001>

<bundles_post_ra>
// kernel: discriminator_forward.4
= control target key start
LH: loop header
LB: loop body
LE: loop exit
PB: predicated region body
PF: predicated region fallthrough
CT: control target
= control target key end

     0   :  { %10 = vsyncpa [#allocation3], 0  ;;  %s2334_s0 = inlined_call_operand.vmem [shape: bf16[2048,48], index: 0, kind: input, shape index: {}]   ;;  %s2335_s1 = inlined_call_operand.vmem [shape: bf16[48,128], index: 1, kind: input, shape index: {}]   ;;  %s2336_s2 = inlined_call_operand.vmem [shape: bf16[2048,128], index: 2, kind: output, shape index: {0}]   ;;  %s2337_s3 = inlined_call_operand.hbm [shape: f32[4,8,128], index: 3, kind: output, shape index: {1}]   ;;  %s2338_s4 = inlined_call_operand.hbm [shape: f32[4,8,128], index: 4, kind: output, shape index: {2}]  }
   0x1   :  { %12 = vsyncpa [#allocation3 + $0x1], 0 }
   0x2   :  { %13 = vsyncpa [#allocation5], 0 }
   0x3   :  { %15 = vsyncpa [#allocation5 + $0x1], 0  ;;  %s1818_s15 = smov 0   ;;  %s1820_s16 = smov 0  }
   0x4   :  { %s1822_s17 = smov 0   ;;  %s1824_s18 = smov 0  }
   0x5 LB: > { %s1839_s19 = sadd.s32 4294967295, %s1791_s18   ;;  %s1230_s20 = sadd.s32 4294967294, %s1791_s18   ;;  %s1791_s18 = sphi %s1824_s18, %s2344_s18   ;;  %s1787_s17 = sphi %s1822_s17, %s2343_s17   ;;  %s1783_s16 = sphi %s1820_s16, %s2342_s16   ;;  %s1779_s15 = sphi %s1818_s15, %s2341_s15  }
   0x6   : > { %s1843_s21 = sadd.s32 1, %s1791_s18   ;;  %s101_s22 = sadd.s32 1, %s1787_s17 }
   0x7   : > { %s98_s23 = ssub.s32 %s1791_s18, %s1843_s21  ;;  %p111_p0 = scmp.ne.s32.totalorder %s1787_s17, %s1783_s16 }
   0x8   : > { %p99_p1 = scmp.eq.s32.totalorder %s98_s23, 0  ;;  %p112_p2 = scmp.eq.s32.totalorder %s1839_s19, 3 }
   0x9   : > { %p117_p3 = scmp.ne.s32.totalorder %s1783_s16, %s1779_s15  ;;  %p118_p4 = scmp.eq.s32.totalorder %s1230_s20, 3 }
   0xa   : > { %s1854_s24 = scalar_select %p99_p1, %s1787_s17, %s101_s22  }
   0xb   : > { %p1856_p5 = por %p112_p2, %p111_p0  ;;  %p1860_p6 = por %p118_p4, %p117_p3 }
   0xc   : > { %p1233_p7 = scmp.ge.s32.totalorder %s1791_s18, 1  ;;  %p174_p8 = scmp.lt.s32.totalorder %s1791_s18, 5 }
   0xe   : > { %p175_p9 = pnand %p1233_p7, %p174_p8 }
   0xf   : > { %s1236_s29 = sshll.u32 (!%p175_p9), %s1839_s19, 6  ;;  %s2278_s20 = sand.u32 (!%p175_p9), 1, %s1783_s16  }
  0x10   : > { %178 = sbr.rel (%p175_p9) target bundleno = 404 (0x194), region = 28  ;;  %p211_p10 = scmp.lt.s32.totalorder (!%p175_p9), %s1236_s29, 255 }
  0x11   : > { %s1234_s22 = sshll.u32 (!%p175_p9), %s2278_s20, 3  ;;  %s1414_s23 = sshll.u32 (!%p175_p9), %s1839_s19, 3 }
  0x12   : > { %s202_s7 = scalar_lea.vmem (!%p175_p9), [#allocation2], %s1234_s22  ;;  %s209_s19 = scalar_lea.vmem (!%p175_p9), [#allocation4], %s1234_s22 }
  0x13   : > { %s1096_s8 = sshll.u32 (!%p175_p9), %s202_s7, 4  ;;  %s1110_s10 = sshll.u32 (!%p175_p9), %s209_s19, 4  ;;  %s1097_s8 = int_to_ptr.vmem [resolvable:$true] %s1096_s8  ;;  %s2288_s10 = int_to_ptr.vmem [resolvable:$true] %s1110_s10 }
  0x14   : > { %s1075_s12 = scalar_lea.sflag (!%p175_p9), [#allocation3], %s2278_s20  ;;  %s1717_s27 = scalar_lea.hbm (!%p175_p9), %s2337_s3, 32 }
  0x15   : > { %v1452_v0 = vld [vmem:[%s2335_s1 + $0x10] sm:$0xff]  ;;  %v1451_v1 = vld [vmem:[%s2335_s1 + $0x8] sm:$0xff]  ;;  %s2346_s29 = smov (!%p211_p10, %s1236_s29), 255  ;;  %v1450_v2 = vld [vmem:[%s2335_s1] sm:$0xff]  ;;  %vm471_vm0 = vcmask 392192  }
  0x16   : > { %573 = vmatpush.bf16.msra.mxu0 %v1452_v0  ;;  %1644 = vmatpush.bf16.msra.mxu1 %v1452_v0  ;;  %s1237_s6 = sshll.u32 %s2346_s29, 2  ;;  %s1094_s29 = scalar_lea.hbm %s2337_s3, %s1414_s23 }
  0x17   : > { %1645 = vmatpush.bf16.msra.mxu2 %v1452_v0  ;;  %1646 = vmatpush.bf16.msra.mxu3 %v1452_v0  ;;  %s1884_s11 = scalar_lea.vmem %s2334_s0, %s1237_s6  ;;  %s1953_s14 = scalar_lea.vmem %s2336_s2, %s1237_s6 }
  0x18   : > { %v1418_v3 = vld [vmem:[%s1884_s11] sm:$0xff]  ;;  %v1419_v5 = vld [vmem:[%s1884_s11 + $0x8] sm:$0xff]  ;;  %v1420_v8 = vld [vmem:[%s1884_s11 + $0x10] sm:$0xff]  ;;  %s1108_s6 = scalar_lea.hbm %s2338_s4, %s1414_s23  ;;  %s1098_s9 = sshll.u32 %s1094_s29, 4  ;;  %s1099_s9 = int_to_ptr.hbm [resolvable:$true] %s1098_s9 }
  0x19   : > { %v1426_v4 = vld [vmem:[%s1884_s11 + $0x40] sm:$0xff]  ;;  %v1427_v6 = vld [vmem:[%s1884_s11 + $0x48] sm:$0xff]  ;;  %v1428_v9 = vld [vmem:[%s1884_s11 + $0x50] sm:$0xff]  ;;  %s1711_s13 = sshra.s32 %s1099_s9, 4  ;;  %s1712_s13 = int_to_ptr.hbm [resolvable:$true] %s1711_s13 }
  0x1a   : > { %574 = vmatpush.bf16.msra.mxu0 %v1451_v1  ;;  %1647 = vmatpush.bf16.msra.mxu1 %v1451_v1  ;;  %v1434_v7 = vld [vmem:[%s1884_s11 + $0x80] sm:$0xff]  ;;  %v1435_v10 = vld [vmem:[%s1884_s11 + $0x88] sm:$0xff]  ;;  %v1421_v11 = vld [vmem:[%s1884_s11 + $0x18] sm:$0xff]  ;;  %p1718_p0 = scmp.lt.s32.totalorder %s1712_s13, %s2337_s3 }
  0x1b   : > { %1648 = vmatpush.bf16.msra.mxu2 %v1451_v1  ;;  %1649 = vmatpush.bf16.msra.mxu3 %v1451_v1  ;;  %v1429_v12 = vld [vmem:[%s1884_s11 + $0x58] sm:$0xff]  ;;  %v1436_v13 = vld [vmem:[%s1884_s11 + $0x90] sm:$0xff]  ;;  %v1442_v14 = vld [vmem:[%s1884_s11 + $0xc0] sm:$0xff] }
  0x1c   : > { %v1422_v15 = vld [vmem:[%s1884_s11 + $0x20] sm:$0xff]  ;;  %v1437_v17 = vld [vmem:[%s1884_s11 + $0x98] sm:$0xff]  ;;  %v1443_v18 = vld [vmem:[%s1884_s11 + $0xc8] sm:$0xff] }
  0x1d   : > { %v1430_v16 = vld [vmem:[%s1884_s11 + $0x60] sm:$0xff]  ;;  %v1423_v19 = vld [vmem:[%s1884_s11 + $0x28] sm:$0xff]  ;;  %v1444_v22 = vld [vmem:[%s1884_s11 + $0xd0] sm:$0xff] }
  0x1e   : > { %575 = vmatpush.bf16.msra.mxu0 %v1450_v2  ;;  %1650 = vmatpush.bf16.msra.mxu1 %v1450_v2  ;;  %v1431_v20 = vld [vmem:[%s1884_s11 + $0x68] sm:$0xff]  ;;  %v1438_v21 = vld [vmem:[%s1884_s11 + $0xa0] sm:$0xff]  ;;  %v1424_v23 = vld [vmem:[%s1884_s11 + $0x30] sm:$0xff] }
  0x1f   : > { %1651 = vmatpush.bf16.msra.mxu2 %v1450_v2  ;;  %1652 = vmatpush.bf16.msra.mxu3 %v1450_v2  ;;  %v1432_v24 = vld [vmem:[%s1884_s11 + $0x70] sm:$0xff]  ;;  %v1439_v25 = vld [vmem:[%s1884_s11 + $0xa8] sm:$0xff]  ;;  %v1445_v26 = vld [vmem:[%s1884_s11 + $0xd8] sm:$0xff] }
  0x20   : > { %v1425_v27 = vld [vmem:[%s1884_s11 + $0x38] sm:$0xff]  ;;  %v1440_v29 = vld [vmem:[%s1884_s11 + $0xb0] sm:$0xff]  ;;  %v1446_v30 = vld [vmem:[%s1884_s11 + $0xe0] sm:$0xff] }
  0x21   : > { %1380 = vmatmul.msk.bf16.vlgmr.msra.gmra.mxu0 %vm471_vm0, %v1418_v3  ;;  %1388 = vmatmul.msk.bf16.vlgmr.msra.gmra.mxu1 %vm471_vm0, %v1426_v4  ;;  %v1433_v28 = vld [vmem:[%s1884_s11 + $0x78] sm:$0xff]  ;;  %v1447_v34 = vld [vmem:[%s1884_s11 + $0xe8] sm:$0xff]  ;;  %v1448_v48 = vld [vmem:[%s1884_s11 + $0xf0] sm:$0xff] }
  0x22   : > { %1396 = vmatmul.msk.bf16.vlgmr.msra.gmra.mxu2 %vm471_vm0, %v1434_v7  ;;  %1404 = vmatmul.msk.bf16.vlgmr.msra.gmra.mxu3 %vm471_vm0, %v1442_v14  ;;  %v1441_v33 = vld [vmem:[%s1884_s11 + $0xb8] sm:$0xff] }
  0x23   : > { %v1449_v0 = vld [vmem:[%s1884_s11 + $0xf8] sm:$0xff]  ;;  %s1112_s11 = sshll.u32 %s1108_s6, 4  ;;  %s2290_s11 = int_to_ptr.hbm [resolvable:$true] %s1112_s11 }
  0x31   : > { %1381 = vmatmul.msk.bf16.gmra.mxu0 %vm471_vm0, %v1419_v5  ;;  %1389 = vmatmul.msk.bf16.gmra.mxu1 %vm471_vm0, %v1427_v6 }
  0x32   : > { %1397 = vmatmul.msk.bf16.gmra.mxu2 %vm471_vm0, %v1435_v10  ;;  %1405 = vmatmul.msk.bf16.gmra.mxu3 %vm471_vm0, %v1443_v18 }
  0x41   : > { %1382 = vmatmul.msk.bf16.gmra.mxu0 %vm471_vm0, %v1420_v8  ;;  %1390 = vmatmul.msk.bf16.gmra.mxu1 %vm471_vm0, %v1428_v9 }
  0x42   : > { %1398 = vmatmul.msk.bf16.gmra.mxu2 %vm471_vm0, %v1436_v13  ;;  %1406 = vmatmul.msk.bf16.gmra.mxu3 %vm471_vm0, %v1444_v22 }
  0x51   : > { %1383 = vmatmul.msk.bf16.gmra.mxu0 %vm471_vm0, %v1421_v11  ;;  %1391 = vmatmul.msk.bf16.gmra.mxu1 %vm471_vm0, %v1429_v12 }
  0x52   : > { %1399 = vmatmul.msk.bf16.gmra.mxu2 %vm471_vm0, %v1437_v17  ;;  %1407 = vmatmul.msk.bf16.gmra.mxu3 %vm471_vm0, %v1445_v26 }
  0x61   : > { %1384 = vmatmul.msk.bf16.gmra.mxu0 %vm471_vm0, %v1422_v15  ;;  %1392 = vmatmul.msk.bf16.gmra.mxu1 %vm471_vm0, %v1430_v16 }
  0x62   : > { %1400 = vmatmul.msk.bf16.gmra.mxu2 %vm471_vm0, %v1438_v21  ;;  %1408 = vmatmul.msk.bf16.gmra.mxu3 %vm471_vm0, %v1446_v30 }
  0x71   : > { %1385 = vmatmul.msk.bf16.gmra.mxu0 %vm471_vm0, %v1423_v19  ;;  %1393 = vmatmul.msk.bf16.gmra.mxu1 %vm471_vm0, %v1431_v20 }
  0x72   : > { %1401 = vmatmul.msk.bf16.gmra.mxu2 %vm471_vm0, %v1439_v25  ;;  %1409 = vmatmul.msk.bf16.gmra.mxu3 %vm471_vm0, %v1447_v34 }
  0x81   : > { %1386 = vmatmul.msk.bf16.gmra.mxu0 %vm471_vm0, %v1424_v23  ;;  %1394 = vmatmul.msk.bf16.gmra.mxu1 %vm471_vm0, %v1432_v24 }
  0x82   : > { %1402 = vmatmul.msk.bf16.gmra.mxu2 %vm471_vm0, %v1440_v29  ;;  %1410 = vmatmul.msk.bf16.gmra.mxu3 %vm471_vm0, %v1448_v48 }
  0x91   : > { %1387 = vmatmul.msk.bf16.gmra.mxu0 %vm471_vm0, %v1425_v27  ;;  %1395 = vmatmul.msk.bf16.gmra.mxu1 %vm471_vm0, %v1433_v28 }
  0x92   : > { %1403 = vmatmul.msk.bf16.gmra.mxu2 %vm471_vm0, %v1441_v33  ;;  %1411 = vmatmul.msk.bf16.gmra.mxu3 %vm471_vm0, %v1449_v0 }
  0x9e   : > { %v577_v31 = vpop.f32.mrf.mxu0  ;;  %v1942_v32 = vpop.f32.mrf.mxu1 }
  0x9f   : > { %v934_v35 = vmul.f32 %v577_v31, %v577_v31 }
  0xa5   : > { %v1969_v55 = vpop.f32.mrf.mxu2  ;;  %v2007_v15 = vpop.f32.mrf.mxu3 }
  0xa6   : > { %v579_v36 = vpop.f32.mrf.mxu0  ;;  %v1955_v37 = vpop.f32.mrf.mxu1 }
  0xa7   : > { %v1456_v38 = vpack.c.bf16 %v579_v36, %v577_v31  ;;  %v865_v39 = vadd.f32 %v579_v36, %v577_v31  ;;  %v935_v40 = vmul.f32 %v579_v36, %v579_v36  ;;  %v1496_v41 = vpack.c.bf16 %v1955_v37, %v1942_v32 }
  0xa9   : > { %1457 = vst [vmem:[%s1953_s14] sm:$0xff] %v1456_v38   ;;  %v998_v42 = vadd.f32 %v935_v40, %v934_v35 }
  0xaa   : > { %1620 = vst [vmem:[%s1953_s14 + $0x40] sm:$0xff] %v1496_v41  }
  0xad   : > { %v1977_v61 = vpop.f32.mrf.mxu2  ;;  %v2015_v19 = vpop.f32.mrf.mxu3 }
  0xae   : > { %v582_v43 = vpop.f32.mrf.mxu0  ;;  %v1961_v44 = vpop.f32.mrf.mxu1  ;;  %v1536_v62 = vpack.c.bf16 %v1977_v61, %v1969_v55  ;;  %v1576_v21 = vpack.c.bf16 %v2015_v19, %v2007_v15 }
  0xaf   : > { %v866_v45 = vadd.f32 %v865_v39, %v582_v43  ;;  %v936_v46 = vmul.f32 %v582_v43, %v582_v43 }
  0xb0   : > { %1628 = vst [vmem:[%s1953_s14 + $0x80] sm:$0xff] %v1536_v62  }
  0xb1   : > { %v999_v47 = vadd.f32 %v998_v42, %v936_v46  ;;  %1636 = vst [vmem:[%s1953_s14 + $0xc0] sm:$0xff] %v1576_v21  }
  0xb5   : > { %v1990_v5 = vpop.f32.mrf.mxu2  ;;  %v2029_v27 = vpop.f32.mrf.mxu3 }
  0xb6   : > { %v584_v49 = vpop.f32.mrf.mxu0  ;;  %v1965_v50 = vpop.f32.mrf.mxu1 }
  0xb7   : > { %v1461_v51 = vpack.c.bf16 %v584_v49, %v582_v43  ;;  %v867_v52 = vadd.f32 %v866_v45, %v584_v49  ;;  %v937_v53 = vmul.f32 %v584_v49, %v584_v49  ;;  %v1501_v54 = vpack.c.bf16 %v1965_v50, %v1961_v44 }
  0xb9   : > { %1613 = vst [vmem:[%s1953_s14 + $0x8] sm:$0xff] %v1461_v51   ;;  %v1000_v56 = vadd.f32 %v999_v47, %v937_v53 }
  0xba   : > { %1621 = vst [vmem:[%s1953_s14 + $0x48] sm:$0xff] %v1501_v54  }
  0xbd   : > { %v1996_v8 = vpop.f32.mrf.mxu2  ;;  %v2037_v31 = vpop.f32.mrf.mxu3 }
  0xbe   : > { %v587_v57 = vpop.f32.mrf.mxu0  ;;  %v1973_v58 = vpop.f32.mrf.mxu1  ;;  %v1541_v9 = vpack.c.bf16 %v1996_v8, %v1990_v5  ;;  %v1581_v34 = vpack.c.bf16 %v2037_v31, %v2029_v27 }
  0xbf   : > { %v1975_v59 = vadd.f32 %v867_v52, %v587_v57  ;;  %v938_v60 = vmul.f32 %v587_v57, %v587_v57 }
  0xc0   : > { %1629 = vst [vmem:[%s1953_s14 + $0x88] sm:$0xff] %v1541_v9  }
  0xc1   : > { %v1981_v63 = vadd.f32 %v1000_v56, %v938_v60  ;;  %1637 = vst [vmem:[%s1953_s14 + $0xc8] sm:$0xff] %v1581_v34  }
  0xc5   : > { %v2005_v14 = vpop.f32.mrf.mxu2  ;;  %v2051_v41 = vpop.f32.mrf.mxu3 }
  0xc6   : > { %v589_v1 = vpop.f32.mrf.mxu0  ;;  %v1986_v2 = vpop.f32.mrf.mxu1 }
  0xc7   : > { %v1466_v3 = vpack.c.bf16 %v589_v1, %v587_v57  ;;  %v1506_v4 = vpack.c.bf16 %v1986_v2, %v1973_v58  ;;  %v939_v47 = vmul.f32 %v589_v1, %v589_v1  ;;  %v869_v52 = vadd.f32 %v1975_v59, %v589_v1 }
  0xc9   : > { %1614 = vst [vmem:[%s1953_s14 + $0x10] sm:$0xff] %v1466_v3   ;;  %v1002_v53 = vadd.f32 %v1981_v63, %v939_v47 }
  0xca   : > { %1622 = vst [vmem:[%s1953_s14 + $0x50] sm:$0xff] %v1506_v4  }
  0xcd   : > { %v2013_v18 = vpop.f32.mrf.mxu2  ;;  %v2059_v46 = vpop.f32.mrf.mxu3 }
  0xce   : > { %v592_v6 = vpop.f32.mrf.mxu0  ;;  %v1994_v7 = vpop.f32.mrf.mxu1  ;;  %v1546_v20 = vpack.c.bf16 %v2013_v18, %v2005_v14  ;;  %v1586_v49 = vpack.c.bf16 %v2059_v46, %v2051_v41 }
  0xcf   : > { %v940_v51 = vmul.f32 %v592_v6, %v592_v6  ;;  %v870_v56 = vadd.f32 %v869_v52, %v592_v6 }
  0xd0   : > { %1630 = vst [vmem:[%s1953_s14 + $0x90] sm:$0xff] %v1546_v20  }
  0xd1   : > { %1638 = vst [vmem:[%s1953_s14 + $0xd0] sm:$0xff] %v1586_v49   ;;  %v1003_v57 = vadd.f32 %v1002_v53, %v940_v51 }
  0xd5   : > { %v2027_v26 = vpop.f32.mrf.mxu2  ;;  %v2075_v59 = vpop.f32.mrf.mxu3 }
  0xd6   : > { %v594_v10 = vpop.f32.mrf.mxu0  ;;  %v2001_v11 = vpop.f32.mrf.mxu1 }
  0xd7   : > { %v1471_v12 = vpack.c.bf16 %v594_v10, %v592_v6  ;;  %v1511_v13 = vpack.c.bf16 %v2001_v11, %v1994_v7  ;;  %v941_v54 = vmul.f32 %v594_v10, %v594_v10  ;;  %v871_v3 = vadd.f32 %v870_v56, %v594_v10 }
  0xd9   : > { %1615 = vst [vmem:[%s1953_s14 + $0x18] sm:$0xff] %v1471_v12   ;;  %v1004_v1 = vadd.f32 %v1003_v57, %v941_v54 }
  0xda   : > { %1623 = vst [vmem:[%s1953_s14 + $0x58] sm:$0xff] %v1511_v13  }
  0xdd   : > { %v2035_v30 = vpop.f32.mrf.mxu2  ;;  %v2083_v49 = vpop.f32.mrf.mxu3 }
  0xde   : > { %v597_v16 = vpop.f32.mrf.mxu0  ;;  %v2011_v17 = vpop.f32.mrf.mxu1  ;;  %v1551_v33 = vpack.c.bf16 %v2035_v30, %v2027_v26  ;;  %v1591_v52 = vpack.c.bf16 %v2083_v49, %v2075_v59 }
  0xdf   : > { %v942_v60 = vmul.f32 %v597_v16, %v597_v16  ;;  %v872_v63 = vadd.f32 %v871_v3, %v597_v16 }
  0xe0   : > { %1631 = vst [vmem:[%s1953_s14 + $0x98] sm:$0xff] %v1551_v33  }
  0xe1   : > { %v1005_v6 = vadd.f32 %v1004_v1, %v942_v60  ;;  %1639 = vst [vmem:[%s1953_s14 + $0xd8] sm:$0xff] %v1591_v52  }
  0xe5   : > { %v2049_v40 = vpop.f32.mrf.mxu2 }
  0xe6   : > { %v599_v22 = vpop.f32.mrf.mxu0  ;;  %v2023_v23 = vpop.f32.mrf.mxu1 }
  0xe7   : > { %v1476_v24 = vpack.c.bf16 %v599_v22, %v597_v16  ;;  %v1516_v25 = vpack.c.bf16 %v2023_v23, %v2011_v17  ;;  %v943_v13 = vmul.f32 %v599_v22, %v599_v22  ;;  %v873_v21 = vadd.f32 %v872_v63, %v599_v22 }
  0xe9   : > { %1616 = vst [vmem:[%s1953_s14 + $0x20] sm:$0xff] %v1476_v24   ;;  %v1006_v24 = vadd.f32 %v1005_v6, %v943_v13  ;;  %v2097_v6 = vpop.f32.mrf.mxu3 }
  0xea   : > { %1624 = vst [vmem:[%s1953_s14 + $0x60] sm:$0xff] %v1516_v25  }
  0xed   : > { %v2057_v45 = vpop.f32.mrf.mxu2 }
  0xee   : > { %v602_v28 = vpop.f32.mrf.mxu0  ;;  %v2033_v29 = vpop.f32.mrf.mxu1  ;;  %v1556_v48 = vpack.c.bf16 %v2057_v45, %v2049_v40 }
  0xef   : > { %v944_v20 = vmul.f32 %v602_v28, %v602_v28  ;;  %v874_v10 = vadd.f32 %v873_v21, %v602_v28 }
  0xf0   : > { %1632 = vst [vmem:[%s1953_s14 + $0xa0] sm:$0xff] %v1556_v48  }
  0xf1   : > { %v1007_v33 = vadd.f32 %v1006_v24, %v944_v20  ;;  %v951_v24 = vmul.f32 %v1955_v37, %v1955_v37 }
  0xf5   : > { %v2073_v12 = vpop.f32.mrf.mxu2 }
  0xf6   : > { %v604_v35 = vpop.f32.mrf.mxu0  ;;  %v2045_v36 = vpop.f32.mrf.mxu1 }
  0xf7   : > { %v1481_v38 = vpack.c.bf16 %v604_v35, %v602_v28  ;;  %v1521_v39 = vpack.c.bf16 %v2045_v36, %v2033_v29  ;;  %v945_v25 = vmul.f32 %v604_v35, %v604_v35  ;;  %v875_v47 = vadd.f32 %v874_v10, %v604_v35 }
  0xf9   : > { %1617 = vst [vmem:[%s1953_s14 + $0x28] sm:$0xff] %v1481_v38   ;;  %v1008_v16 = vadd.f32 %v1007_v33, %v945_v25  ;;  %v952_v33 = vmul.f32 %v1961_v44, %v1961_v44 }
  0xfa   : > { %1625 = vst [vmem:[%s1953_s14 + $0x68] sm:$0xff] %v1521_v39  }
  0xfd   : > { %v2081_v48 = vpop.f32.mrf.mxu2 }
  0xfe   : > { %v607_v42 = vpop.f32.mrf.mxu0  ;;  %v2055_v43 = vpop.f32.mrf.mxu1  ;;  %v1561_v22 = vpack.c.bf16 %v2081_v48, %v2073_v12 }
  0xff   : > { %v946_v34 = vmul.f32 %v607_v42, %v607_v42  ;;  %v876_v28 = vadd.f32 %v875_v47, %v607_v42  ;;  %v953_v47 = vmul.f32 %v1965_v50, %v1965_v50 }
 0x100   : > { %1633 = vst [vmem:[%s1953_s14 + $0xa8] sm:$0xff] %v1561_v22   ;;  %v2115_v22 = vpop.f32.mrf.mxu3 }
 0x101   : > { %v1009_v53 = vadd.f32 %v1008_v16, %v946_v34  ;;  %v1596_v52 = vpack.c.bf16 %v2115_v22, %v2097_v6 }
 0x103   : > { %1640 = vst [vmem:[%s1953_s14 + $0xe0] sm:$0xff] %v1596_v52  }
 0x106   : > { %v609_v62 = vpop.f32.mrf.mxu0  ;;  %v2069_v0 = vpop.f32.mrf.mxu1 }
 0x107   : > { %v1486_v4 = vpack.c.bf16 %v609_v62, %v607_v42  ;;  %v1526_v9 = vpack.c.bf16 %v2069_v0, %v2055_v43  ;;  %v947_v51 = vmul.f32 %v609_v62, %v609_v62  ;;  %v877_v56 = vadd.f32 %v876_v28, %v609_v62  ;;  %v2095_v42 = vpop.f32.mrf.mxu2 }
 0x108   : > { %v950_v62 = vmul.f32 %v1942_v32, %v1942_v32  ;;  %v963_v52 = vmul.f32 %v2069_v0, %v2069_v0 }
 0x109   : > { %1618 = vst [vmem:[%s1953_s14 + $0x30] sm:$0xff] %v1486_v4   ;;  %v1010_v35 = vadd.f32 %v1009_v53, %v947_v51 }
 0x10a   : > { %1626 = vst [vmem:[%s1953_s14 + $0x70] sm:$0xff] %v1526_v9  }
 0x10e   : > { %v612_v38 = vpop.f32.mrf.mxu0  ;;  %v2079_v39 = vpop.f32.mrf.mxu1 }
 0x10f   : > { %v948_v54 = vmul.f32 %v612_v38, %v612_v38  ;;  %v878_v57 = vadd.f32 %v877_v56, %v612_v38  ;;  %v2113_v51 = vpop.f32.mrf.mxu2 }
 0x111   : > { %v1011_v60 = vadd.f32 %v1010_v35, %v948_v54  ;;  %v956_v35 = vmul.f32 %v1994_v7, %v1994_v7 }
 0x116   : > { %v614_v3 = vpop.f32.mrf.mxu0  ;;  %v2091_v4 = vpop.f32.mrf.mxu1 }
 0x117   : > { %v1491_v9 = vpack.c.bf16 %v614_v3, %v612_v38  ;;  %v879_v1 = vadd.f32 %v878_v57, %v614_v3  ;;  %v949_v13 = vmul.f32 %v614_v3, %v614_v3  ;;  %v1531_v63 = vpack.c.bf16 %v2091_v4, %v2079_v39 }
 0x118   : > { %v957_v3 = vmul.f32 %v2001_v11, %v2001_v11 }
 0x119   : > { %1619 = vst [vmem:[%s1953_s14 + $0x38] sm:$0xff] %v1491_v9   ;;  %v880_v20 = vadd.f32 %v879_v1, %v1942_v32  ;;  %v1012_v21 = vadd.f32 %v1011_v60, %v949_v13  ;;  %v2135_v1 = vpop.f32.mrf.mxu2  ;;  %v2137_v13 = vpop.f32.mrf.mxu3 }
 0x11a   : > { %1627 = vst [vmem:[%s1953_s14 + $0x78] sm:$0xff] %v1531_v63  }
 0x11b   : > { %v881_v25 = vadd.f32 %v880_v20, %v1955_v37  ;;  %v1013_v10 = vadd.f32 %v1012_v21, %v950_v62  ;;  %v1566_v37 = vpack.c.bf16 %v2113_v51, %v2095_v42  ;;  %v959_v20 = vmul.f32 %v2023_v23, %v2023_v23 }
 0x11d   : > { %v882_v34 = vadd.f32 %v881_v25, %v1961_v44  ;;  %v1014_v38 = vadd.f32 %v1013_v10, %v951_v24  ;;  %v954_v44 = vmul.f32 %v1973_v58, %v1973_v58  ;;  %1634 = vst [vmem:[%s1953_s14 + $0xb0] sm:$0xff] %v1566_v37   ;;  %v961_v10 = vmul.f32 %v2045_v36, %v2045_v36 }
 0x11f   : > { %v883_v32 = vadd.f32 %v882_v34, %v1965_v50  ;;  %v1015_v16 = vadd.f32 %v1014_v38, %v952_v33  ;;  %v955_v50 = vmul.f32 %v1986_v2, %v1986_v2 }
 0x121   : > { %v884_v28 = vadd.f32 %v883_v32, %v1973_v58  ;;  %v1016_v53 = vadd.f32 %v1015_v16, %v953_v47  ;;  %v2151_v34 = vpop.f32.mrf.mxu2  ;;  %v2153_v38 = vpop.f32.mrf.mxu3  ;;  %v962_v32 = vmul.f32 %v2055_v43, %v2055_v43 }
 0x122   : > { %v1601_v47 = vpack.c.bf16 %v2153_v38, %v2137_v13 }
 0x123   : > { %v885_v54 = vadd.f32 %v884_v28, %v1986_v2  ;;  %v1017_v56 = vadd.f32 %v1016_v53, %v954_v44  ;;  %v958_v2 = vmul.f32 %v2011_v17, %v2011_v17  ;;  %v964_v53 = vmul.f32 %v2079_v39, %v2079_v39 }
 0x124   : > { %1641 = vst [vmem:[%s1953_s14 + $0xe8] sm:$0xff] %v1601_v47   ;;  %v974_v47 = vmul.f32 %v2049_v40, %v2049_v40 }
 0x125   : > { %v1018_v57 = vadd.f32 %v1017_v56, %v955_v50  ;;  %v886_v60 = vadd.f32 %v885_v54, %v1994_v7 }
 0x127   : > { %v887_v58 = vadd.f32 %v886_v60, %v2001_v11  ;;  %v1019_v9 = vadd.f32 %v1018_v57, %v956_v35  ;;  %v960_v11 = vmul.f32 %v2033_v29, %v2033_v29  ;;  %v966_v35 = vmul.f32 %v1969_v55, %v1969_v55 }
 0x128   : > { %v967_v60 = vmul.f32 %v1977_v61, %v1977_v61 }
 0x129   : > { %v888_v63 = vadd.f32 %v887_v58, %v2011_v17  ;;  %v1020_v62 = vadd.f32 %v1019_v9, %v957_v3  ;;  %v2173_v56 = vpop.f32.mrf.mxu3  ;;  %v968_v58 = vmul.f32 %v1990_v5, %v1990_v5 }
 0x12b   : > { %v889_v7 = vadd.f32 %v888_v63, %v2023_v23  ;;  %v1021_v21 = vadd.f32 %v1020_v62, %v958_v2  ;;  %v1571_v23 = vpack.c.bf16 %v2151_v34, %v2135_v1  ;;  %v969_v2 = vmul.f32 %v1996_v8, %v1996_v8 }
 0x12d   : > { %v890_v24 = vadd.f32 %v889_v7, %v2033_v29  ;;  %v1022_v25 = vadd.f32 %v1021_v21, %v959_v20  ;;  %1635 = vst [vmem:[%s1953_s14 + $0xb8] sm:$0xff] %v1571_v23  }
 0x12f   : > { %v891_v17 = vadd.f32 %v890_v24, %v2045_v36  ;;  %v1023_v33 = vadd.f32 %v1022_v25, %v960_v11 }
 0x131   : > { %v892_v29 = vadd.f32 %v891_v17, %v2055_v43  ;;  %v1024_v16 = vadd.f32 %v1023_v33, %v961_v10  ;;  %v965_v43 = vmul.f32 %v2091_v4, %v2091_v4  ;;  %v2187_v62 = vpop.f32.mrf.mxu3  ;;  %v973_v17 = vmul.f32 %v2035_v30, %v2035_v30 }
 0x132   : > { %v1606_v20 = vpack.c.bf16 %v2187_v62, %v2173_v56 }
 0x133   : > { %v1025_v37 = vadd.f32 %v1024_v16, %v962_v32  ;;  %v893_v36 = vadd.f32 %v892_v29, %v2069_v0  ;;  %v975_v32 = vmul.f32 %v2057_v45, %v2057_v45 }
 0x134   : > { %1642 = vst [vmem:[%s1953_s14 + $0xf0] sm:$0xff] %v1606_v20  }
 0x135   : > { %v1026_v44 = vadd.f32 %v1025_v37, %v963_v52  ;;  %v894_v28 = vadd.f32 %v893_v36, %v2079_v39  ;;  %v976_v37 = vmul.f32 %v2073_v12, %v2073_v12 }
 0x137   : > { %v1027_v50 = vadd.f32 %v1026_v44, %v964_v53  ;;  %v895_v54 = vadd.f32 %v894_v28, %v2091_v4  ;;  %v977_v44 = vmul.f32 %v2081_v48, %v2081_v48 }
 0x139   : > { %v896_v0 = vadd.f32 %v895_v54, %v1969_v55  ;;  %v1028_v57 = vadd.f32 %v1027_v50, %v965_v43  ;;  %v2204_v23 = vpop.f32.mrf.mxu3 }
 0x13b   : > { %v897_v39 = vadd.f32 %v896_v0, %v1977_v61  ;;  %v1029_v3 = vadd.f32 %v1028_v57, %v966_v35  ;;  %v970_v61 = vmul.f32 %v2005_v14, %v2005_v14  ;;  %v979_v35 = vmul.f32 %v2113_v51, %v2113_v51 }
 0x13c   : > { %v980_v57 = vmul.f32 %v2135_v1, %v2135_v1 }
 0x13d   : > { %v898_v4 = vadd.f32 %v897_v39, %v1990_v5  ;;  %v1030_v9 = vadd.f32 %v1029_v3, %v967_v60  ;;  %v971_v5 = vmul.f32 %v2013_v18, %v2013_v18  ;;  %v981_v3 = vmul.f32 %v2151_v34, %v2151_v34 }
 0x13f   : > { %v899_v63 = vadd.f32 %v898_v4, %v1996_v8  ;;  %v1031_v55 = vadd.f32 %v1030_v9, %v968_v58  ;;  %v972_v8 = vmul.f32 %v2027_v26, %v2027_v26 }
 0x141   : > { %v900_v7 = vadd.f32 %v899_v63, %v2005_v14  ;;  %v1032_v21 = vadd.f32 %v1031_v55, %v969_v2  ;;  %v734_v28 = vpop.f32.mrf.mxu3 }
 0x142   : > { %v1611_v53 = vpack.c.bf16 %v734_v28, %v2204_v23 }
 0x143   : > { %v901_v11 = vadd.f32 %v900_v7, %v2013_v18  ;;  %v1033_v24 = vadd.f32 %v1032_v21, %v970_v61 }
 0x144   : > { %1643 = vst [vmem:[%s1953_s14 + $0xf8] sm:$0xff] %v1611_v53   ;;  %v997_v53 = vmul.f32 %v734_v28, %v734_v28  ;;  %s1713_s14 = scalar_lea.hbm %s1712_s13, 8 }
 0x145   : > { %v1034_v25 = vadd.f32 %v1033_v24, %v971_v5  ;;  %v902_v10 = vadd.f32 %v901_v11, %v2027_v26  ;;  %p1714_p11 = scmp.ne.s32.totalorder %s1712_s13, %s1713_s14  ;;  %p1719_p1 = scmp.lt.s32.totalorder %s1717_s27, %s1713_s14 }
 0x147   : > { %v903_v33 = vadd.f32 %v902_v10, %v2035_v30  ;;  %v1035_v14 = vadd.f32 %v1034_v25, %v972_v8  ;;  %p1715_p12 = pnand %p1714_p11, %p1856_p5  ;;  %p1720_p2 = por %p1719_p1, %p1718_p0 }
 0x149   : > { %v904_v18 = vadd.f32 %v903_v33, %v2049_v40  ;;  %v1036_v29 = vadd.f32 %v1035_v14, %v973_v17  ;;  %p1716_p13 = pneg %p1715_p12 }
 0x14b   : > { %v905_v26 = vadd.f32 %v904_v18, %v2057_v45  ;;  %v1037_v16 = vadd.f32 %v1036_v29, %v974_v47  ;;  %v978_v45 = vmul.f32 %v2095_v42, %v2095_v42  ;;  %p1721_p3 = pnand %p1720_p2, %p1716_p13 }
 0x14d   : > { %v906_v30 = vadd.f32 %v905_v26, %v2073_v12  ;;  %v1038_v36 = vadd.f32 %v1037_v16, %v975_v32  ;;  %v993_v32 = vmul.f32 %v2153_v38, %v2153_v38 }
 0x14f   : > { %v907_v52 = vadd.f32 %v906_v30, %v2081_v48  ;;  %v1039_v40 = vadd.f32 %v1038_v36, %v976_v37 }
 0x151   : > { %v1040_v50 = vadd.f32 %v1039_v40, %v977_v44  ;;  %v908_v54 = vadd.f32 %v907_v52, %v2095_v42  ;;  %v982_v42 = vmul.f32 %v2007_v15, %v2007_v15 }
 0x153   : > { %v1041_v43 = vadd.f32 %v1040_v50, %v978_v45  ;;  %v909_v12 = vadd.f32 %v908_v54, %v2113_v51  ;;  %v983_v51 = vmul.f32 %v2015_v19, %v2015_v19 }
 0x155   : > { %v1042_v0 = vadd.f32 %v1041_v43, %v979_v35  ;;  %v910_v48 = vadd.f32 %v909_v12, %v2135_v1  ;;  %v984_v1 = vmul.f32 %v2029_v27, %v2029_v27 }
 0x157   : > { %v1043_v60 = vadd.f32 %v1042_v0, %v980_v57  ;;  %v911_v39 = vadd.f32 %v910_v48, %v2151_v34  ;;  %v985_v34 = vmul.f32 %v2037_v31, %v2037_v31 }
 0x159   : > { %v912_v58 = vadd.f32 %v911_v39, %v2007_v15  ;;  %v1044_v4 = vadd.f32 %v1043_v60, %v981_v3  ;;  %v986_v15 = vmul.f32 %v2051_v41, %v2051_v41 }
 0x15b   : > { %v913_v9 = vadd.f32 %v912_v58, %v2015_v19  ;;  %v1045_v2 = vadd.f32 %v1044_v4, %v982_v42  ;;  %v987_v19 = vmul.f32 %v2059_v46, %v2059_v46 }
 0x15d   : > { %v914_v63 = vadd.f32 %v913_v9, %v2029_v27  ;;  %v1046_v55 = vadd.f32 %v1045_v2, %v983_v51  ;;  %v988_v27 = vmul.f32 %v2075_v59, %v2075_v59 }
 0x15f   : > { %v915_v20 = vadd.f32 %v914_v63, %v2037_v31  ;;  %v1047_v61 = vadd.f32 %v1046_v55, %v984_v1  ;;  %v989_v31 = vmul.f32 %v2083_v49, %v2083_v49 }
 0x161   : > { %v916_v7 = vadd.f32 %v915_v20, %v2051_v41  ;;  %v1048_v21 = vadd.f32 %v1047_v61, %v985_v34  ;;  %v990_v41 = vmul.f32 %v2097_v6, %v2097_v6 }
 0x163   : > { %v917_v5 = vadd.f32 %v916_v7, %v2059_v46  ;;  %v1049_v11 = vadd.f32 %v1048_v21, %v986_v15  ;;  %v991_v46 = vmul.f32 %v2115_v22, %v2115_v22 }
 0x165   : > { %v1050_v24 = vadd.f32 %v1049_v11, %v987_v19  ;;  %v918_v8 = vadd.f32 %v917_v5, %v2075_v59  ;;  %v992_v59 = vmul.f32 %v2137_v13, %v2137_v13 }
 0x167   : > { %v919_v25 = vadd.f32 %v918_v8, %v2083_v49  ;;  %v1051_v10 = vadd.f32 %v1050_v24, %v988_v27 }
 0x169   : > { %v920_v17 = vadd.f32 %v919_v25, %v2097_v6  ;;  %v1052_v33 = vadd.f32 %v1051_v10, %v989_v31 }
 0x16b   : > { %v921_v14 = vadd.f32 %v920_v17, %v2115_v22  ;;  %v1053_v47 = vadd.f32 %v1052_v33, %v990_v41  ;;  %v994_v22 = vmul.f32 %v2173_v56, %v2173_v56 }
 0x16d   : > { %v922_v18 = vadd.f32 %v921_v14, %v2137_v13  ;;  %v1054_v29 = vadd.f32 %v1053_v47, %v991_v46  ;;  %v995_v13 = vmul.f32 %v2187_v62, %v2187_v62 }
 0x16f   : > { %v923_v49 = vadd.f32 %v922_v18, %v2153_v38  ;;  %v1055_v6 = vadd.f32 %v1054_v29, %v992_v59  ;;  %v996_v38 = vmul.f32 %v2204_v23, %v2204_v23 }
 0x171   : > { %v1056_v26 = vadd.f32 %v1055_v6, %v993_v32  ;;  %v924_v16 = vadd.f32 %v923_v49, %v2173_v56 }
 0x173   : > { %v1057_v37 = vadd.f32 %v1056_v26, %v994_v22  ;;  %v925_v30 = vadd.f32 %v924_v16, %v2187_v62 }
 0x175   : > { %v1058_v36 = vadd.f32 %v1057_v37, %v995_v13  ;;  %v926_v52 = vadd.f32 %v925_v30, %v2204_v23 }
 0x177   : > { %v1059_v44 = vadd.f32 %v1058_v36, %v996_v38  ;;  %v927_v40 = vadd.f32 %v926_v52, %v734_v28 }
 0x179   : > { %v928_v50 = vrot.slane %v927_v40, 4  ;;  %v1060_v56 = vadd.f32 %v1059_v44, %v997_v53 }
 0x17b   : > { %v929_v54 = vadd.f32 %v928_v50, %v927_v40  ;;  %v1061_v45 = vrot.slane %v1060_v56, 4 }
 0x17d   : > { %v930_v43 = vrot.slane %v929_v54, 2  ;;  %v1062_v62 = vadd.f32 %v1061_v45, %v1060_v56 }
 0x17f   : > { %v931_v12 = vadd.f32 %v930_v43, %v929_v54  ;;  %v1063_v23 = vrot.slane %v1062_v62, 2 }
 0x181   : > { %v932_v28 = vrot.slane %v931_v12, 1  ;;  %v1064_v35 = vadd.f32 %v1063_v23, %v1062_v62 }
 0x183   : > { %v933_v0 = vadd.f32 %v932_v28, %v931_v12  ;;  %v1065_v48 = vrot.slane %v1064_v35, 1 }
 0x185   : > { %1067 = vst [vmem:[%s202_s7] sm:$0xff] %v933_v0  ;;  %v1066_v57 = vadd.f32 %v1065_v48, %v1064_v35 }
 0x186   : > { %1724 = shalt.err (!%p1721_p3)
}
 0x187   : > { %1653 = dma.vmem_to_hbm [thread:$0]  (%p1856_p5), %s1097_s8, 128, %s1099_s9, %s1075_s12   ;;  %1068 = vst [vmem:[%s209_s19] sm:$0xff] %v1066_v57 }
 0x188   : > { %s1080_s30 = scalar_lea.sflag [#allocation5], %s2278_s20  ;;  %s1739_s5 = sshra.s32 %s2290_s11, 4  ;;  %s1740_s5 = int_to_ptr.hbm [resolvable:$true] %s1739_s5 }
 0x189   : > { %s1741_s6 = scalar_lea.hbm %s1740_s5, 8  ;;  %s1745_s14 = scalar_lea.hbm %s2338_s4, 32 }
 0x18a   : > { %p1742_p4 = scmp.ne.s32.totalorder %s1740_s5, %s1741_s6  ;;  %p1746_p9 = scmp.lt.s32.totalorder %s1740_s5, %s2338_s4 }
 0x18b   : > { %p1747_p10 = scmp.lt.s32.totalorder %s1745_s14, %s1741_s6 }
 0x18c   : > { %p1743_p7 = pnand %p1742_p4, %p1856_p5 }
 0x18d   : > { %p1748_p11 = por %p1747_p10, %p1746_p9 }
 0x18e   : > { %p1744_p8 = pneg %p1743_p7 }
 0x190   : > { %p1749_p12 = pnand %p1748_p11, %p1744_p8 }
 0x192   : > { %1752 = shalt.err (!%p1749_p12)
}
 0x193   : > { %1654 = dma.vmem_to_hbm [thread:$0]  (%p1856_p5), %s2288_s10, 128, %s2290_s11, %s1080_s30  }
 0x194 PF: > { %p1664_p13 = scmp.ge.s32.totalorder %s1791_s18, 2  ;;  %s1132_s20 = sand.u32 1, %s1779_s15  }
 0x195   : > { %s1133_s8 = scalar_lea.sflag [#allocation3], %s1132_s20 }
 0x196   : > { %p1658_p0 = pnand %p1664_p13, %p1860_p6 }
 0x198   : > { %p1659_p1 = pneg %p1658_p0 }
 0x19a   : > { %1770 = dma.done.wait (%p1659_p1), %s1133_s8, 128  }
 0x19b   : > { %1772 = vsyncadd (%p1659_p1), %s1133_s8, 4294967168  ;;  %s1143_s9 = scalar_lea.sflag [#allocation5], %s1132_s20 }
 0x19c   : > { %1774 = dma.done.wait (%p1659_p1), %s1143_s9, 128  }
 0x19d   : > { %1776 = vsyncadd (%p1659_p1), %s1143_s9, 4294967168  ;;  %p18_p5 = scmp.ge.s32.totalorder %s1843_s21, 6   ;;  %s2341_s15 = smov %s1783_s16 }
 0x19e   : > { %s2342_s16 = smov %s1787_s17  ;;  %s2343_s17 = smov %s1854_s24 }
 0x19f   : > { %s2344_s18 = smov %s1843_s21  ;;  %20 = sbr.rel (!%p18_p5) target bundleno = 5 (0x5), region = 92 }
 0x1a4   :  { %1149 = vsyncpa [#allocation3], 1 }
 0x1a5   :  { %1151 = vsyncpa [#allocation3 + $0x1], 1 }
 0x1a6   :  { %1152 = vsyncpa [#allocation5], 1 }
 0x1a7   :  { %1154 = vsyncpa [#allocation5 + $0x1], 1 }

// kernel: discriminator_forward.5
= control target key start
LH: loop header
LB: loop body
LE: loop exit
PB: predicated region body
PF: predicated region fallthrough
CT: control target
= control target key end

     0   :  { %s1086_s15 = smov 0   ;;  %s1301_s0 = inlined_call_operand.vmem [shape: bf16[512,128], index: 0, kind: input, shape index: {}]   ;;  %s1302_s1 = inlined_call_operand.vmem [shape: bf16[128,128], index: 1, kind: input, shape index: {}]   ;;  %s1303_s2 = inlined_call_operand.vmem [shape: bf16[512,128], index: 2, kind: output, shape index: {0}]   ;;  %s1304_s3 = inlined_call_operand.vmem [shape: f32[2,8,128], index: 3, kind: output, shape index: {1}]   ;;  %s1305_s4 = inlined_call_operand.vmem [shape: f32[2,8,128], index: 4, kind: output, shape index: {2}]  }
   0x1 LB: > { %s1092_s16 = sadd.s32 4294967295, %s1059_s15   ;;  %p797_p0 = scmp.ge.s32.totalorder %s1059_s15, 1  ;;  %s1059_s15 = sphi %s1086_s15, %s15_s15  }
   0x2   : > { %p168_p1 = scmp.lt.s32.totalorder %s1059_s15, 3 }
   0x4   : > { %p169_p2 = pnand %p797_p0, %p168_p1 }
   0x5   : > { %s798_s25 = sshll.u32 (!%p169_p2), %s1092_s16, 5  ;;  %p214_p4 = scmp.lt.s32.totalorder (!%p169_p2), %s1092_s16, 1 }
   0x6   : > { %172 = sbr.rel (%p169_p2) target bundleno = 290 (0x122), region = 28  ;;  %p203_p3 = scmp.lt.s32.totalorder (!%p169_p2), %s798_s25, 63 }
   0xb   : > { %v925_v0 = vld [vmem:[%s1302_s1 + $0x38] sm:$0xff]  ;;  %v924_v1 = vld [vmem:[%s1302_s1 + $0x30] sm:$0xff]  ;;  %v923_v2 = vld [vmem:[%s1302_s1 + $0x28] sm:$0xff]  ;;  %s1307_s25 = smov (!%p203_p3, %s798_s25), 63  ;;  %s1309_s16 = smov (!%p214_p4, %s1092_s16), 1 }
   0xc   : > { %414 = vmatpush.bf16.msra.mxu0 %v925_v0  ;;  %1021 = vmatpush.bf16.msra.mxu1 %v925_v0  ;;  %v922_v3 = vld [vmem:[%s1302_s1 + $0x20] sm:$0xff]  ;;  %v921_v4 = vld [vmem:[%s1302_s1 + $0x18] sm:$0xff]  ;;  %v920_v5 = vld [vmem:[%s1302_s1 + $0x10] sm:$0xff]  ;;  %s799_s6 = sshll.u32 %s1307_s25, 2  ;;  %s802_s17 = sshll.u32 %s1309_s16, 3 }
   0xd   : > { %1022 = vmatpush.bf16.msra.mxu2 %v925_v0  ;;  %1023 = vmatpush.bf16.msra.mxu3 %v925_v0  ;;  %v919_v6 = vld [vmem:[%s1302_s1 + $0x8] sm:$0xff]  ;;  %v918_v7 = vld [vmem:[%s1302_s1] sm:$0xff]  ;;  %s1129_s11 = scalar_lea.vmem %s1301_s0, %s799_s6  ;;  %s1156_s14 = scalar_lea.vmem %s1303_s2, %s799_s6 }
   0xe   : > { %v902_v8 = vld [vmem:[%s1129_s11] sm:$0xff]  ;;  %v903_v12 = vld [vmem:[%s1129_s11 + $0x8] sm:$0xff]  ;;  %v904_v16 = vld [vmem:[%s1129_s11 + $0x10] sm:$0xff]  ;;  %s217_s20 = scalar_lea.vmem %s1304_s3, %s802_s17  ;;  %s221_s23 = scalar_lea.vmem %s1305_s4, %s802_s17 }
   0xf   : > { %v906_v9 = vld [vmem:[%s1129_s11 + $0x20] sm:$0xff]  ;;  %v907_v13 = vld [vmem:[%s1129_s11 + $0x28] sm:$0xff]  ;;  %v908_v17 = vld [vmem:[%s1129_s11 + $0x30] sm:$0xff] }
  0x10   : > { %415 = vmatpush.bf16.msra.mxu0 %v924_v1  ;;  %1024 = vmatpush.bf16.msra.mxu1 %v924_v1  ;;  %v910_v10 = vld [vmem:[%s1129_s11 + $0x40] sm:$0xff]  ;;  %v911_v14 = vld [vmem:[%s1129_s11 + $0x48] sm:$0xff]  ;;  %v912_v18 = vld [vmem:[%s1129_s11 + $0x50] sm:$0xff] }
  0x11   : > { %1025 = vmatpush.bf16.msra.mxu2 %v924_v1  ;;  %1026 = vmatpush.bf16.msra.mxu3 %v924_v1  ;;  %v914_v11 = vld [vmem:[%s1129_s11 + $0x60] sm:$0xff]  ;;  %v915_v15 = vld [vmem:[%s1129_s11 + $0x68] sm:$0xff]  ;;  %v916_v19 = vld [vmem:[%s1129_s11 + $0x70] sm:$0xff] }
  0x12   : > { %v905_v20 = vld [vmem:[%s1129_s11 + $0x18] sm:$0xff] }
  0x13   : > { %v909_v21 = vld [vmem:[%s1129_s11 + $0x38] sm:$0xff] }
  0x14   : > { %416 = vmatpush.bf16.msra.mxu0 %v923_v2  ;;  %1027 = vmatpush.bf16.msra.mxu1 %v923_v2  ;;  %v913_v22 = vld [vmem:[%s1129_s11 + $0x58] sm:$0xff] }
  0x15   : > { %1028 = vmatpush.bf16.msra.mxu2 %v923_v2  ;;  %1029 = vmatpush.bf16.msra.mxu3 %v923_v2  ;;  %v917_v23 = vld [vmem:[%s1129_s11 + $0x78] sm:$0xff] }
  0x18   : > { %417 = vmatpush.bf16.msra.mxu0 %v922_v3  ;;  %1030 = vmatpush.bf16.msra.mxu1 %v922_v3 }
  0x19   : > { %1031 = vmatpush.bf16.msra.mxu2 %v922_v3  ;;  %1032 = vmatpush.bf16.msra.mxu3 %v922_v3 }
  0x1c   : > { %418 = vmatpush.bf16.msra.mxu0 %v921_v4  ;;  %1033 = vmatpush.bf16.msra.mxu1 %v921_v4 }
  0x1d   : > { %1034 = vmatpush.bf16.msra.mxu2 %v921_v4  ;;  %1035 = vmatpush.bf16.msra.mxu3 %v921_v4 }
  0x20   : > { %419 = vmatpush.bf16.msra.mxu0 %v920_v5  ;;  %1036 = vmatpush.bf16.msra.mxu1 %v920_v5 }
  0x21   : > { %1037 = vmatpush.bf16.msra.mxu2 %v920_v5  ;;  %1038 = vmatpush.bf16.msra.mxu3 %v920_v5 }
  0x24   : > { %420 = vmatpush.bf16.msra.mxu0 %v919_v6  ;;  %1039 = vmatpush.bf16.msra.mxu1 %v919_v6 }
  0x25   : > { %1040 = vmatpush.bf16.msra.mxu2 %v919_v6  ;;  %1041 = vmatpush.bf16.msra.mxu3 %v919_v6 }
  0x28   : > { %421 = vmatpush.bf16.msra.mxu0 %v918_v7  ;;  %1042 = vmatpush.bf16.msra.mxu1 %v918_v7 }
  0x29   : > { %1043 = vmatpush.bf16.msra.mxu2 %v918_v7  ;;  %1044 = vmatpush.bf16.msra.mxu3 %v918_v7 }
  0x2b   : > { %422 = vmatmul.bf16.vlgmr.msra.gmra.mxu0 %v902_v8  ;;  %442 = vmatmul.bf16.vlgmr.msra.gmra.mxu1 %v906_v9 }
  0x2c   : > { %462 = vmatmul.bf16.vlgmr.msra.gmra.mxu2 %v910_v10  ;;  %482 = vmatmul.bf16.vlgmr.msra.gmra.mxu3 %v914_v11 }
  0x3b   : > { %427 = vmatmul.bf16.gmra.mxu0 %v903_v12  ;;  %447 = vmatmul.bf16.gmra.mxu1 %v907_v13 }
  0x3c   : > { %467 = vmatmul.bf16.gmra.mxu2 %v911_v14  ;;  %487 = vmatmul.bf16.gmra.mxu3 %v915_v15 }
  0x4b   : > { %432 = vmatmul.bf16.gmra.mxu0 %v904_v16  ;;  %452 = vmatmul.bf16.gmra.mxu1 %v908_v17 }
  0x4c   : > { %472 = vmatmul.bf16.gmra.mxu2 %v912_v18  ;;  %492 = vmatmul.bf16.gmra.mxu3 %v916_v19 }
  0x5b   : > { %437 = vmatmul.bf16.gmra.mxu0 %v905_v20  ;;  %457 = vmatmul.bf16.gmra.mxu1 %v909_v21 }
  0x5c   : > { %477 = vmatmul.bf16.gmra.mxu2 %v913_v22  ;;  %497 = vmatmul.bf16.gmra.mxu3 %v917_v23 }
  0xa8   : > { %v423_v24 = vpop.f32.mrf.mxu0  ;;  %v1147_v25 = vpop.f32.mrf.mxu1 }
  0xa9   : > { %v604_v57 = vmul.f32 %v423_v24, %v423_v24 }
  0xaf   : > { %v1149_v26 = vpop.f32.mrf.mxu2  ;;  %v1162_v31 = vpop.f32.mrf.mxu3 }
  0xb0   : > { %v425_v27 = vpop.f32.mrf.mxu0  ;;  %v1158_v28 = vpop.f32.mrf.mxu1 }
  0xb1   : > { %v929_v29 = vpack.c.bf16 %v425_v27, %v423_v24  ;;  %v949_v30 = vpack.c.bf16 %v1158_v28, %v1147_v25  ;;  %v605_v56 = vmul.f32 %v425_v27, %v425_v27  ;;  %v567_v59 = vadd.f32 %v425_v27, %v423_v24 }
  0xb2   : > { %v612_v27 = vmul.f32 %v1147_v25, %v1147_v25 }
  0xb3   : > { %930 = vst [vmem:[%s1156_s14] sm:$0xff] %v929_v29   ;;  %v636_v60 = vadd.f32 %v605_v56, %v604_v57 }
  0xb4   : > { %1009 = vst [vmem:[%s1156_s14 + $0x20] sm:$0xff] %v949_v30  }
  0xb7   : > { %v1166_v32 = vpop.f32.mrf.mxu2  ;;  %v1172_v36 = vpop.f32.mrf.mxu3 }
  0xb8   : > { %v428_v33 = vpop.f32.mrf.mxu0  ;;  %v1168_v34 = vpop.f32.mrf.mxu1  ;;  %v969_v35 = vpack.c.bf16 %v1166_v32, %v1149_v26  ;;  %v989_v37 = vpack.c.bf16 %v1172_v36, %v1162_v31 }
  0xb9   : > { %v606_v58 = vmul.f32 %v428_v33, %v428_v33  ;;  %v568_v62 = vadd.f32 %v567_v59, %v428_v33 }
  0xba   : > { %1013 = vst [vmem:[%s1156_s14 + $0x40] sm:$0xff] %v969_v35  }
  0xbb   : > { %1017 = vst [vmem:[%s1156_s14 + $0x60] sm:$0xff] %v989_v37   ;;  %v637_v0 = vadd.f32 %v636_v60, %v606_v58 }
  0xbf   : > { %v1178_v38 = vpop.f32.mrf.mxu2  ;;  %v1184_v43 = vpop.f32.mrf.mxu3 }
  0xc0   : > { %v430_v39 = vpop.f32.mrf.mxu0  ;;  %v1180_v40 = vpop.f32.mrf.mxu1 }
  0xc1   : > { %v934_v41 = vpack.c.bf16 %v430_v39, %v428_v33  ;;  %v954_v42 = vpack.c.bf16 %v1180_v40, %v1168_v34  ;;  %v607_v61 = vmul.f32 %v430_v39, %v430_v39  ;;  %v569_v5 = vadd.f32 %v568_v62, %v430_v39 }
  0xc2   : > { %v613_v33 = vmul.f32 %v1158_v28, %v1158_v28  ;;  %v614_v39 = vmul.f32 %v1168_v34, %v1168_v34 }
  0xc3   : > { %1006 = vst [vmem:[%s1156_s14 + $0x8] sm:$0xff] %v934_v41   ;;  %v638_v7 = vadd.f32 %v637_v0, %v607_v61 }
  0xc4   : > { %1010 = vst [vmem:[%s1156_s14 + $0x28] sm:$0xff] %v954_v42  }
  0xc7   : > { %v1188_v44 = vpop.f32.mrf.mxu2  ;;  %v1194_v48 = vpop.f32.mrf.mxu3 }
  0xc8   : > { %v433_v45 = vpop.f32.mrf.mxu0  ;;  %v1190_v46 = vpop.f32.mrf.mxu1  ;;  %v974_v47 = vpack.c.bf16 %v1188_v44, %v1178_v38  ;;  %v994_v49 = vpack.c.bf16 %v1194_v48, %v1184_v43 }
  0xc9   : > { %v608_v1 = vmul.f32 %v433_v45, %v433_v45  ;;  %v570_v10 = vadd.f32 %v569_v5, %v433_v45  ;;  %v621_v5 = vmul.f32 %v1166_v32, %v1166_v32 }
  0xca   : > { %1014 = vst [vmem:[%s1156_s14 + $0x48] sm:$0xff] %v974_v47  }
  0xcb   : > { %1018 = vst [vmem:[%s1156_s14 + $0x68] sm:$0xff] %v994_v49   ;;  %v639_v11 = vadd.f32 %v638_v7, %v608_v1 }
  0xcf   : > { %v1200_v50 = vpop.f32.mrf.mxu2  ;;  %v1206_v55 = vpop.f32.mrf.mxu3 }
  0xd0   : > { %v435_v51 = vpop.f32.mrf.mxu0  ;;  %v1202_v52 = vpop.f32.mrf.mxu1 }
  0xd1   : > { %v939_v53 = vpack.c.bf16 %v435_v51, %v433_v45  ;;  %v959_v54 = vpack.c.bf16 %v1202_v52, %v1190_v46  ;;  %v609_v8 = vmul.f32 %v435_v51, %v435_v51  ;;  %v571_v13 = vadd.f32 %v570_v10, %v435_v51 }
  0xd2   : > { %v617_v57 = vmul.f32 %v1202_v52, %v1202_v52  ;;  %v623_v10 = vmul.f32 %v1188_v44, %v1188_v44 }
  0xd3   : > { %1007 = vst [vmem:[%s1156_s14 + $0x10] sm:$0xff] %v939_v53   ;;  %v640_v14 = vadd.f32 %v639_v11, %v609_v8 }
  0xd4   : > { %1011 = vst [vmem:[%s1156_s14 + $0x30] sm:$0xff] %v959_v54   ;;  %v616_v54 = vmul.f32 %v1190_v46, %v1190_v46 }
  0xd7   : > { %v1210_v63 = vpop.f32.mrf.mxu2  ;;  %v1214_v6 = vpop.f32.mrf.mxu3 }
  0xd8   : > { %v438_v2 = vpop.f32.mrf.mxu0  ;;  %v458_v3 = vpop.f32.mrf.mxu1  ;;  %v979_v4 = vpack.c.bf16 %v1210_v63, %v1200_v50  ;;  %v999_v9 = vpack.c.bf16 %v1214_v6, %v1206_v55 }
  0xd9   : > { %v610_v12 = vmul.f32 %v438_v2, %v438_v2  ;;  %v572_v15 = vadd.f32 %v571_v13, %v438_v2  ;;  %v618_v60 = vmul.f32 %v458_v3, %v458_v3 }
  0xda   : > { %1015 = vst [vmem:[%s1156_s14 + $0x50] sm:$0xff] %v979_v4  }
  0xdb   : > { %1019 = vst [vmem:[%s1156_s14 + $0x70] sm:$0xff] %v999_v9   ;;  %v641_v17 = vadd.f32 %v640_v14, %v610_v12 }
  0xdf   : > { %v478_v16 = vpop.f32.mrf.mxu2  ;;  %v1220_v24 = vpop.f32.mrf.mxu3 }
  0xe0   : > { %v440_v18 = vpop.f32.mrf.mxu0  ;;  %v460_v19 = vpop.f32.mrf.mxu1 }
  0xe1   : > { %v944_v20 = vpack.c.bf16 %v440_v18, %v438_v2  ;;  %v573_v21 = vadd.f32 %v572_v15, %v440_v18  ;;  %v611_v22 = vmul.f32 %v440_v18, %v440_v18  ;;  %v964_v23 = vpack.c.bf16 %v460_v19, %v458_v3 }
  0xe2   : > { %v619_v1 = vmul.f32 %v460_v19, %v460_v19  ;;  %v620_v2 = vmul.f32 %v1149_v26, %v1149_v26  ;;  %v625_v15 = vmul.f32 %v1210_v63, %v1210_v63 }
  0xe3   : > { %1008 = vst [vmem:[%s1156_s14 + $0x18] sm:$0xff] %v944_v20   ;;  %v574_v29 = vadd.f32 %v573_v21, %v1147_v25  ;;  %v642_v30 = vadd.f32 %v641_v17, %v611_v22  ;;  %v615_v25 = vmul.f32 %v1180_v40, %v1180_v40 }
  0xe4   : > { %1012 = vst [vmem:[%s1156_s14 + $0x38] sm:$0xff] %v964_v23  }
  0xe5   : > { %v575_v35 = vadd.f32 %v574_v29, %v1158_v28  ;;  %v643_v37 = vadd.f32 %v642_v30, %v612_v27 }
  0xe7   : > { %v576_v41 = vadd.f32 %v575_v35, %v1168_v34  ;;  %v644_v42 = vadd.f32 %v643_v37, %v613_v33  ;;  %v480_v45 = vpop.f32.mrf.mxu2  ;;  %v1236_v53 = vpop.f32.mrf.mxu3  ;;  %v631_v35 = vmul.f32 %v1194_v48, %v1194_v48 }
  0xe8   : > { %v984_v47 = vpack.c.bf16 %v480_v45, %v478_v16  ;;  %v1004_v28 = vpack.c.bf16 %v1236_v53, %v1220_v24  ;;  %v627_v22 = vmul.f32 %v480_v45, %v480_v45 }
  0xe9   : > { %v645_v49 = vadd.f32 %v644_v42, %v614_v39  ;;  %v577_v51 = vadd.f32 %v576_v41, %v1180_v40  ;;  %v632_v39 = vmul.f32 %v1206_v55, %v1206_v55 }
  0xea   : > { %1016 = vst [vmem:[%s1156_s14 + $0x58] sm:$0xff] %v984_v47  }
  0xeb   : > { %v578_v34 = vadd.f32 %v577_v51, %v1190_v46  ;;  %v646_v56 = vadd.f32 %v645_v49, %v615_v25  ;;  %1020 = vst [vmem:[%s1156_s14 + $0x78] sm:$0xff] %v1004_v28   ;;  %v634_v49 = vmul.f32 %v1220_v24, %v1220_v24 }
  0xed   : > { %v579_v58 = vadd.f32 %v578_v34, %v1202_v52  ;;  %v647_v59 = vadd.f32 %v646_v56, %v616_v54  ;;  %v622_v52 = vmul.f32 %v1178_v38, %v1178_v38 }
  0xef   : > { %v580_v40 = vadd.f32 %v579_v58, %v458_v3  ;;  %v648_v61 = vadd.f32 %v647_v59, %v617_v57 }
  0xf1   : > { %v649_v62 = vadd.f32 %v648_v61, %v618_v60  ;;  %v581_v0 = vadd.f32 %v580_v40, %v460_v19  ;;  %v626_v19 = vmul.f32 %v478_v16, %v478_v16 }
  0xf3   : > { %v582_v4 = vadd.f32 %v581_v0, %v1149_v26  ;;  %v650_v46 = vadd.f32 %v649_v62, %v619_v1  ;;  %v624_v26 = vmul.f32 %v1200_v50, %v1200_v50 }
  0xf5   : > { %v583_v7 = vadd.f32 %v582_v4, %v1166_v32  ;;  %v651_v8 = vadd.f32 %v650_v46, %v620_v2 }
  0xf7   : > { %v584_v3 = vadd.f32 %v583_v7, %v1178_v38  ;;  %v652_v9 = vadd.f32 %v651_v8, %v621_v5 }
  0xf9   : > { %v653_v11 = vadd.f32 %v652_v9, %v622_v52  ;;  %v585_v12 = vadd.f32 %v584_v3, %v1188_v44  ;;  %v628_v44 = vmul.f32 %v1162_v31, %v1162_v31 }
  0xfb   : > { %v586_v13 = vadd.f32 %v585_v12, %v1200_v50  ;;  %v654_v14 = vadd.f32 %v653_v11, %v623_v10  ;;  %v629_v50 = vmul.f32 %v1172_v36, %v1172_v36 }
  0xfd   : > { %v587_v32 = vadd.f32 %v586_v13, %v1210_v63  ;;  %v655_v17 = vadd.f32 %v654_v14, %v624_v26  ;;  %v630_v63 = vmul.f32 %v1184_v43, %v1184_v43 }
  0xff   : > { %v656_v38 = vadd.f32 %v655_v17, %v625_v15  ;;  %v588_v18 = vadd.f32 %v587_v32, %v478_v16 }
 0x101   : > { %v657_v20 = vadd.f32 %v656_v38, %v626_v19  ;;  %v589_v21 = vadd.f32 %v588_v18, %v480_v45  ;;  %v633_v45 = vmul.f32 %v1214_v6, %v1214_v6 }
 0x103   : > { %v590_v23 = vadd.f32 %v589_v21, %v1162_v31  ;;  %v658_v27 = vadd.f32 %v657_v20, %v627_v22 }
 0x105   : > { %v591_v29 = vadd.f32 %v590_v23, %v1172_v36  ;;  %v659_v30 = vadd.f32 %v658_v27, %v628_v44 }
 0x107   : > { %v592_v16 = vadd.f32 %v591_v29, %v1184_v43  ;;  %v660_v33 = vadd.f32 %v659_v30, %v629_v50 }
 0x109   : > { %v661_v37 = vadd.f32 %v660_v33, %v630_v63  ;;  %v593_v31 = vadd.f32 %v592_v16, %v1194_v48 }
 0x10b   : > { %v594_v36 = vadd.f32 %v593_v31, %v1206_v55  ;;  %v662_v41 = vadd.f32 %v661_v37, %v631_v35  ;;  %v635_v55 = vmul.f32 %v1236_v53, %v1236_v53 }
 0x10d   : > { %v595_v42 = vadd.f32 %v594_v36, %v1214_v6  ;;  %v663_v43 = vadd.f32 %v662_v41, %v632_v39 }
 0x10f   : > { %v664_v47 = vadd.f32 %v663_v43, %v633_v45  ;;  %v596_v25 = vadd.f32 %v595_v42, %v1220_v24 }
 0x111   : > { %v665_v48 = vadd.f32 %v664_v47, %v634_v49  ;;  %v597_v51 = vadd.f32 %v596_v25, %v1236_v53 }
 0x113   : > { %v598_v28 = vrot.slane %v597_v51, 4  ;;  %v666_v54 = vadd.f32 %v665_v48, %v635_v55 }
 0x115   : > { %v599_v34 = vadd.f32 %v598_v28, %v597_v51  ;;  %v667_v56 = vrot.slane %v666_v54, 4 }
 0x117   : > { %v600_v6 = vrot.slane %v599_v34, 2  ;;  %v668_v57 = vadd.f32 %v667_v56, %v666_v54 }
 0x119   : > { %v601_v58 = vadd.f32 %v600_v6, %v599_v34  ;;  %v669_v59 = vrot.slane %v668_v57, 2 }
 0x11b   : > { %v602_v40 = vrot.slane %v601_v58, 1  ;;  %v670_v60 = vadd.f32 %v669_v59, %v668_v57 }
 0x11d   : > { %v603_v24 = vadd.f32 %v602_v40, %v601_v58  ;;  %v671_v61 = vrot.slane %v670_v60, 1 }
 0x11f   : > { %v672_v53 = vadd.f32 %v671_v61, %v670_v60  ;;  %673 = vst [vmem:[%s217_s20] sm:$0xff] %v603_v24 }
 0x121   : > { %674 = vst [vmem:[%s221_s23] sm:$0xff] %v672_v53 }
 0x122 PF: > { %s15_s15 = sadd.s32 1, %s1059_s15  }
 0x123   : > { %p12_p5 = scmp.ge.s32.totalorder %s15_s15, 4  }
 0x125   :  { %14 = sbr.rel (!%p12_p5) target bundleno = 1 (0x1), region = 82 }

// kernel: discriminator_forward.6
= control target key start
LH: loop header
LB: loop body
LE: loop exit
PB: predicated region body
PF: predicated region fallthrough
CT: control target
= control target key end

     0   :  { %s844_s15 = smov 0   ;;  %s948_s0 = inlined_call_operand.vmem [shape: bf16[128,256], index: 0, kind: input, shape index: {}]   ;;  %s949_s1 = inlined_call_operand.vmem [shape: bf16[256,128], index: 1, kind: input, shape index: {}]   ;;  %s950_s2 = inlined_call_operand.vmem [shape: bf16[128,128], index: 2, kind: output, shape index: {0}]   ;;  %s951_s3 = inlined_call_operand.vmem [shape: f32[2,8,128], index: 3, kind: output, shape index: {1}]   ;;  %s952_s4 = inlined_call_operand.vmem [shape: f32[2,8,128], index: 4, kind: output, shape index: {2}]  }
   0x1 LB: > { %s850_s16 = sadd.s32 4294967295, %s817_s15   ;;  %p633_p0 = scmp.ge.s32.totalorder %s817_s15, 1  ;;  %s817_s15 = sphi %s844_s15, %s15_s15  }
   0x2   : > { %p169_p1 = scmp.lt.s32.totalorder %s817_s15, 3 }
   0x4   : > { %p170_p2 = pnand %p633_p0, %p169_p1 }
   0x5   : > { %s634_s29 = sshll.u32 (!%p170_p2), %s850_s16, 3  ;;  %p217_p4 = scmp.lt.s32.totalorder (!%p170_p2), %s850_s16, 1 }
   0x6   : > { %173 = sbr.rel (%p170_p2) target bundleno = 221 (0xdd), region = 28  ;;  %p205_p3 = scmp.lt.s32.totalorder (!%p170_p2), %s634_s29, 15 }
   0xb   : > { %v755_v0 = vld [vmem:[%s949_s1 + $0x38] sm:$0xff]  ;;  %v754_v2 = vld [vmem:[%s949_s1 + $0x30] sm:$0xff]  ;;  %v753_v4 = vld [vmem:[%s949_s1 + $0x28] sm:$0xff]  ;;  %s954_s29 = smov (!%p205_p3, %s634_s29), 15  ;;  %s956_s16 = smov (!%p217_p4, %s850_s16), 1 }
   0xc   : > { %v763_v1 = vld [vmem:[%s949_s1 + $0x78] sm:$0xff]  ;;  %401 = vmatpush.bf16.msra.mxu0 %v755_v0  ;;  %787 = vmatpush.bf16.msra.mxu2 %v755_v0  ;;  %v762_v3 = vld [vmem:[%s949_s1 + $0x70] sm:$0xff]  ;;  %v761_v5 = vld [vmem:[%s949_s1 + $0x68] sm:$0xff]  ;;  %s739_s18 = sshll.u32 %s954_s29, 3  ;;  %s638_s5 = sshll.u32 %s954_s29, 2 }
   0xd   : > { %430 = vmatpush.bf16.msra.mxu1 %v763_v1  ;;  %795 = vmatpush.bf16.msra.mxu3 %v763_v1  ;;  %v752_v6 = vld [vmem:[%s949_s1 + $0x20] sm:$0xff]  ;;  %v751_v8 = vld [vmem:[%s949_s1 + $0x18] sm:$0xff]  ;;  %v750_v10 = vld [vmem:[%s949_s1 + $0x10] sm:$0xff]  ;;  %s900_s23 = scalar_lea.vmem %s948_s0, %s739_s18  ;;  %s931_s8 = scalar_lea.vmem %s950_s2, %s638_s5 }
   0xe   : > { %v760_v7 = vld [vmem:[%s949_s1 + $0x60] sm:$0xff]  ;;  %v759_v9 = vld [vmem:[%s949_s1 + $0x58] sm:$0xff]  ;;  %v758_v11 = vld [vmem:[%s949_s1 + $0x50] sm:$0xff]  ;;  %s639_s29 = sshll.u32 %s956_s16, 3 }
   0xf   : > { %v749_v12 = vld [vmem:[%s949_s1 + $0x8] sm:$0xff]  ;;  %v748_v14 = vld [vmem:[%s949_s1] sm:$0xff]  ;;  %v651_v28 = vld [vmem:[%s900_s23 + $0x10] sm:$0xf]  ;;  %s220_s11 = scalar_lea.vmem %s951_s3, %s639_s29  ;;  %s224_s14 = scalar_lea.vmem %s952_s4, %s639_s29 }
  0x10   : > { %402 = vmatpush.bf16.msra.mxu0 %v754_v2  ;;  %788 = vmatpush.bf16.msra.mxu2 %v754_v2  ;;  %v757_v13 = vld [vmem:[%s949_s1 + $0x48] sm:$0xff]  ;;  %v756_v15 = vld [vmem:[%s949_s1 + $0x40] sm:$0xff]  ;;  %v743_v29 = vld [vmem:[%s900_s23 + $0x14] sm:$0xf0] }
  0x11   : > { %431 = vmatpush.bf16.msra.mxu1 %v762_v3  ;;  %796 = vmatpush.bf16.msra.mxu3 %v762_v3  ;;  %v643_v16 = vld [vmem:[%s900_s23] sm:$0xf]  ;;  %v741_v17 = vld [vmem:[%s900_s23 + $0x4] sm:$0xf0]  ;;  %v740_v20 = vld [vmem:[%s900_s23 + $0x4] sm:$0xf]  ;;  %v652_v36 = vor.u32 %v743_v29, %v651_v28 }
  0x12   : > { %v659_v18 = vld [vmem:[%s900_s23 + $0x20] sm:$0xf]  ;;  %v745_v19 = vld [vmem:[%s900_s23 + $0x24] sm:$0xf0]  ;;  %v645_v21 = vld [vmem:[%s900_s23 + $0x8] sm:$0xf0]  ;;  %v644_v24 = vor.u32 %v741_v17, %v643_v16 }
  0x13   : > { %v744_v22 = vld [vmem:[%s900_s23 + $0x24] sm:$0xf]  ;;  %v661_v23 = vld [vmem:[%s900_s23 + $0x28] sm:$0xf0]  ;;  %v660_v25 = vor.u32 %v745_v19, %v659_v18  ;;  %v648_v26 = vor.u32 %v740_v20, %v645_v21  ;;  %v667_v30 = vld [vmem:[%s900_s23 + $0x30] sm:$0xf] }
  0x14   : > { %403 = vmatpush.bf16.msra.mxu0 %v753_v4  ;;  %789 = vmatpush.bf16.msra.mxu2 %v753_v4  ;;  %v664_v27 = vor.u32 %v744_v22, %v661_v23  ;;  %v747_v31 = vld [vmem:[%s900_s23 + $0x34] sm:$0xf0]  ;;  %v742_v32 = vld [vmem:[%s900_s23 + $0x14] sm:$0xf]  ;;  %v653_v33 = vld [vmem:[%s900_s23 + $0x18] sm:$0xf0] }
  0x15   : > { %432 = vmatpush.bf16.msra.mxu1 %v761_v5  ;;  %797 = vmatpush.bf16.msra.mxu3 %v761_v5  ;;  %v746_v34 = vld [vmem:[%s900_s23 + $0x34] sm:$0xf]  ;;  %v669_v35 = vld [vmem:[%s900_s23 + $0x38] sm:$0xf0]  ;;  %v668_v37 = vor.u32 %v747_v31, %v667_v30  ;;  %v656_v38 = vor.u32 %v742_v32, %v653_v33 }
  0x16   : > { %v672_v39 = vor.u32 %v746_v34, %v669_v35 }
  0x18   : > { %404 = vmatpush.bf16.msra.mxu0 %v752_v6  ;;  %790 = vmatpush.bf16.msra.mxu2 %v752_v6 }
  0x19   : > { %433 = vmatpush.bf16.msra.mxu1 %v760_v7  ;;  %798 = vmatpush.bf16.msra.mxu3 %v760_v7 }
  0x1c   : > { %405 = vmatpush.bf16.msra.mxu0 %v751_v8  ;;  %791 = vmatpush.bf16.msra.mxu2 %v751_v8 }
  0x1d   : > { %434 = vmatpush.bf16.msra.mxu1 %v759_v9  ;;  %799 = vmatpush.bf16.msra.mxu3 %v759_v9 }
  0x20   : > { %406 = vmatpush.bf16.msra.mxu0 %v750_v10  ;;  %792 = vmatpush.bf16.msra.mxu2 %v750_v10 }
  0x21   : > { %435 = vmatpush.bf16.msra.mxu1 %v758_v11  ;;  %800 = vmatpush.bf16.msra.mxu3 %v758_v11 }
  0x24   : > { %407 = vmatpush.bf16.msra.mxu0 %v749_v12  ;;  %793 = vmatpush.bf16.msra.mxu2 %v749_v12 }
  0x25   : > { %436 = vmatpush.bf16.msra.mxu1 %v757_v13  ;;  %801 = vmatpush.bf16.msra.mxu3 %v757_v13 }
  0x28   : > { %408 = vmatpush.bf16.msra.mxu0 %v748_v14  ;;  %794 = vmatpush.bf16.msra.mxu2 %v748_v14 }
  0x29   : > { %437 = vmatpush.bf16.msra.mxu1 %v756_v15  ;;  %802 = vmatpush.bf16.msra.mxu3 %v756_v15 }
  0x2b   : > { %409 = vmatmul.bf16.vlgmr.msra.gmra.mxu0 %v644_v24  ;;  %419 = vmatmul.bf16.vlgmr.msra.gmra.mxu2 %v660_v25 }
  0x2c   : > { %438 = vmatmul.bf16.vlgmr.msra.gmra.mxu1 %v648_v26  ;;  %448 = vmatmul.bf16.vlgmr.msra.gmra.mxu3 %v664_v27 }
  0x3b   : > { %414 = vmatmul.bf16.gmra.mxu0 %v652_v36  ;;  %424 = vmatmul.bf16.gmra.mxu2 %v668_v37 }
  0x3c   : > { %443 = vmatmul.bf16.gmra.mxu1 %v656_v38  ;;  %453 = vmatmul.bf16.gmra.mxu3 %v672_v39 }
  0xa8   : > { %v410_v40 = vpop.f32.mrf.mxu0 }
  0xa9   : > { %v439_v41 = vpop.f32.mrf.mxu1 }
  0xaa   : > { %v440_v46 = vadd.f32 %v439_v41, %v410_v40 }
  0xac   : > { %v488_v60 = vmul.f32 %v440_v46, %v440_v46 }
  0xae   : > { %v420_v42 = vpop.f32.mrf.mxu2 }
  0xaf   : > { %v449_v43 = vpop.f32.mrf.mxu3 }
  0xb0   : > { %v412_v44 = vpop.f32.mrf.mxu0  ;;  %v450_v51 = vadd.f32 %v449_v43, %v420_v42 }
  0xb1   : > { %v441_v45 = vpop.f32.mrf.mxu1 }
  0xb2   : > { %v442_v47 = vadd.f32 %v441_v45, %v412_v44  ;;  %v492_v8 = vmul.f32 %v450_v51, %v450_v51 }
  0xb4   : > { %v767_v48 = vpack.c.bf16 %v442_v47, %v440_v46  ;;  %v489_v57 = vmul.f32 %v442_v47, %v442_v47  ;;  %v475_v61 = vadd.f32 %v442_v47, %v440_v46 }
  0xb6   : > { %768 = vst [vmem:[%s931_s8] sm:$0xff] %v767_v48   ;;  %v422_v49 = vpop.f32.mrf.mxu2  ;;  %v496_v1 = vadd.f32 %v489_v57, %v488_v60 }
  0xb7   : > { %v451_v50 = vpop.f32.mrf.mxu3 }
  0xb8   : > { %v452_v52 = vadd.f32 %v451_v50, %v422_v49  ;;  %v415_v53 = vpop.f32.mrf.mxu0 }
  0xb9   : > { %v444_v54 = vpop.f32.mrf.mxu1 }
  0xba   : > { %v777_v55 = vpack.c.bf16 %v452_v52, %v450_v51  ;;  %v445_v56 = vadd.f32 %v444_v54, %v415_v53  ;;  %v493_v14 = vmul.f32 %v452_v52, %v452_v52 }
  0xbc   : > { %785 = vst [vmem:[%s931_s8 + $0x10] sm:$0xff] %v777_v55   ;;  %v490_v62 = vmul.f32 %v445_v56, %v445_v56  ;;  %v476_v2 = vadd.f32 %v475_v61, %v445_v56 }
  0xbe   : > { %v425_v58 = vpop.f32.mrf.mxu2  ;;  %v497_v4 = vadd.f32 %v496_v1, %v490_v62 }
  0xbf   : > { %v454_v59 = vpop.f32.mrf.mxu3 }
  0xc0   : > { %v417_v63 = vpop.f32.mrf.mxu0  ;;  %v455_v9 = vadd.f32 %v454_v59, %v425_v58 }
  0xc1   : > { %v446_v0 = vpop.f32.mrf.mxu1 }
  0xc2   : > { %v447_v3 = vadd.f32 %v446_v0, %v417_v63  ;;  %v494_v18 = vmul.f32 %v455_v9, %v455_v9 }
  0xc4   : > { %v772_v5 = vpack.c.bf16 %v447_v3, %v445_v56  ;;  %v477_v6 = vadd.f32 %v476_v2, %v447_v3  ;;  %v491_v7 = vmul.f32 %v447_v3, %v447_v3 }
  0xc6   : > { %784 = vst [vmem:[%s931_s8 + $0x8] sm:$0xff] %v772_v5   ;;  %v478_v10 = vadd.f32 %v477_v6, %v450_v51  ;;  %v498_v11 = vadd.f32 %v497_v4, %v491_v7  ;;  %v427_v12 = vpop.f32.mrf.mxu2 }
  0xc7   : > { %v456_v13 = vpop.f32.mrf.mxu3 }
  0xc8   : > { %v499_v15 = vadd.f32 %v498_v11, %v492_v8  ;;  %v457_v16 = vadd.f32 %v456_v13, %v427_v12  ;;  %v479_v17 = vadd.f32 %v478_v10, %v452_v52 }
  0xca   : > { %v782_v19 = vpack.c.bf16 %v457_v16, %v455_v9  ;;  %v480_v20 = vadd.f32 %v479_v17, %v455_v9  ;;  %v500_v21 = vadd.f32 %v499_v15, %v493_v14  ;;  %v495_v23 = vmul.f32 %v457_v16, %v457_v16 }
  0xcc   : > { %786 = vst [vmem:[%s931_s8 + $0x18] sm:$0xff] %v782_v19   ;;  %v481_v22 = vadd.f32 %v480_v20, %v457_v16  ;;  %v501_v24 = vadd.f32 %v500_v21, %v494_v18 }
  0xce   : > { %v482_v25 = vrot.slane %v481_v22, 4  ;;  %v502_v26 = vadd.f32 %v501_v24, %v495_v23 }
  0xd0   : > { %v483_v27 = vadd.f32 %v482_v25, %v481_v22  ;;  %v503_v28 = vrot.slane %v502_v26, 4 }
  0xd2   : > { %v484_v29 = vrot.slane %v483_v27, 2  ;;  %v504_v30 = vadd.f32 %v503_v28, %v502_v26 }
  0xd4   : > { %v485_v31 = vadd.f32 %v484_v29, %v483_v27  ;;  %v505_v32 = vrot.slane %v504_v30, 2 }
  0xd6   : > { %v486_v33 = vrot.slane %v485_v31, 1  ;;  %v506_v34 = vadd.f32 %v505_v32, %v504_v30 }
  0xd8   : > { %v487_v35 = vadd.f32 %v486_v33, %v485_v31  ;;  %v507_v36 = vrot.slane %v506_v34, 1 }
  0xda   : > { %v508_v37 = vadd.f32 %v507_v36, %v506_v34  ;;  %509 = vst [vmem:[%s220_s11] sm:$0xff] %v487_v35 }
  0xdc   : > { %510 = vst [vmem:[%s224_s14] sm:$0xff] %v508_v37 }
  0xdd PF: > { %s15_s15 = sadd.s32 1, %s817_s15  }
  0xde   : > { %p12_p5 = scmp.ge.s32.totalorder %s15_s15, 4  }
  0xe0   :  { %14 = sbr.rel (!%p12_p5) target bundleno = 1 (0x1), region = 82 }

// kernel: discriminator_forward.7
= control target key start
LH: loop header
LB: loop body
LE: loop exit
PB: predicated region body
PF: predicated region fallthrough
CT: control target
= control target key end

     0   :  { %s942_s15 = smov 0   ;;  %s1070_s0 = inlined_call_operand.vmem [shape: bf16[32,512], index: 0, kind: input, shape index: {}]   ;;  %s1071_s1 = inlined_call_operand.vmem [shape: bf16[512,128], index: 1, kind: input, shape index: {}]   ;;  %s1072_s2 = inlined_call_operand.vmem [shape: bf16[32,128], index: 2, kind: output, shape index: {0}]   ;;  %s1073_s3 = inlined_call_operand.vmem [shape: f32[2,8,128], index: 3, kind: output, shape index: {1}]   ;;  %s1074_s4 = inlined_call_operand.vmem [shape: f32[2,8,128], index: 4, kind: output, shape index: {2}]  }
   0x1 LB: > { %s948_s16 = sadd.s32 4294967295, %s915_s15   ;;  %p705_p0 = scmp.ge.s32.totalorder %s915_s15, 1  ;;  %s915_s15 = sphi %s942_s15, %s15_s15  }
   0x2   : > { %p169_p1 = scmp.lt.s32.totalorder %s915_s15, 3 }
   0x4   : > { %p170_p2 = pnand %p705_p0, %p169_p1 }
   0x5   : > { %s706_s17 = sshll.u32 (!%p170_p2), %s948_s16, 1  ;;  %p217_p4 = scmp.lt.s32.totalorder (!%p170_p2), %s948_s16, 1 }
   0x6   : > { %173 = sbr.rel (%p170_p2) target bundleno = 206 (0xce), region = 28  ;;  %p205_p3 = scmp.lt.s32.totalorder (!%p170_p2), %s706_s17, 3 }
   0xb   : > { %v871_v0 = vld [vmem:[%s1071_s1 + $0x38] sm:$0xff]  ;;  %v870_v4 = vld [vmem:[%s1071_s1 + $0x30] sm:$0xff]  ;;  %v869_v8 = vld [vmem:[%s1071_s1 + $0x28] sm:$0xff]  ;;  %s1076_s17 = smov (!%p205_p3, %s706_s17), 3  ;;  %s1078_s16 = smov (!%p217_p4, %s948_s16), 1 }
   0xc   : > { %v879_v1 = vld [vmem:[%s1071_s1 + $0x78] sm:$0xff]  ;;  %505 = vmatpush.bf16.msra.mxu0 %v871_v0  ;;  %v878_v5 = vld [vmem:[%s1071_s1 + $0x70] sm:$0xff]  ;;  %v877_v9 = vld [vmem:[%s1071_s1 + $0x68] sm:$0xff]  ;;  %s859_s19 = sshll.u32 %s1076_s17, 4  ;;  %s710_s13 = sshll.u32 %s1076_s17, 2 }
   0xd   : > { %v887_v2 = vld [vmem:[%s1071_s1 + $0xb8] sm:$0xff]  ;;  %519 = vmatpush.bf16.msra.mxu1 %v879_v1  ;;  %v886_v6 = vld [vmem:[%s1071_s1 + $0xb0] sm:$0xff]  ;;  %v885_v10 = vld [vmem:[%s1071_s1 + $0xa8] sm:$0xff]  ;;  %s209_s26 = scalar_lea.vmem %s1070_s0, %s859_s19  ;;  %s215_s19 = scalar_lea.vmem %s1072_s2, %s710_s13 }
   0xe   : > { %v895_v3 = vld [vmem:[%s1071_s1 + $0xf8] sm:$0xff]  ;;  %533 = vmatpush.bf16.msra.mxu2 %v887_v2  ;;  %v894_v7 = vld [vmem:[%s1071_s1 + $0xf0] sm:$0xff]  ;;  %v893_v11 = vld [vmem:[%s1071_s1 + $0xe8] sm:$0xff]  ;;  %s711_s17 = sshll.u32 %s1078_s16, 3 }
   0xf   : > { %547 = vmatpush.bf16.msra.mxu3 %v895_v3  ;;  %v868_v12 = vld [vmem:[%s1071_s1 + $0x20] sm:$0xff]  ;;  %v867_v16 = vld [vmem:[%s1071_s1 + $0x18] sm:$0xff]  ;;  %v866_v20 = vld [vmem:[%s1071_s1 + $0x10] sm:$0xff]  ;;  %s220_s22 = scalar_lea.vmem %s1073_s3, %s711_s17  ;;  %s224_s25 = scalar_lea.vmem %s1074_s4, %s711_s17 }
  0x10   : > { %506 = vmatpush.bf16.msra.mxu0 %v870_v4  ;;  %v876_v13 = vld [vmem:[%s1071_s1 + $0x60] sm:$0xff]  ;;  %v875_v17 = vld [vmem:[%s1071_s1 + $0x58] sm:$0xff]  ;;  %v874_v21 = vld [vmem:[%s1071_s1 + $0x50] sm:$0xff] }
  0x11   : > { %520 = vmatpush.bf16.msra.mxu1 %v878_v5  ;;  %v884_v14 = vld [vmem:[%s1071_s1 + $0xa0] sm:$0xff]  ;;  %v883_v18 = vld [vmem:[%s1071_s1 + $0x98] sm:$0xff]  ;;  %v882_v22 = vld [vmem:[%s1071_s1 + $0x90] sm:$0xff] }
  0x12   : > { %534 = vmatpush.bf16.msra.mxu2 %v886_v6  ;;  %v892_v15 = vld [vmem:[%s1071_s1 + $0xe0] sm:$0xff]  ;;  %v891_v19 = vld [vmem:[%s1071_s1 + $0xd8] sm:$0xff]  ;;  %v890_v23 = vld [vmem:[%s1071_s1 + $0xd0] sm:$0xff] }
  0x13   : > { %548 = vmatpush.bf16.msra.mxu3 %v894_v7  ;;  %v865_v24 = vld [vmem:[%s1071_s1 + $0x8] sm:$0xff]  ;;  %v864_v28 = vld [vmem:[%s1071_s1] sm:$0xff]  ;;  %v862_v33 = vld [vmem:[%s209_s26 + $0xc] sm:$0xf0] }
  0x14   : > { %507 = vmatpush.bf16.msra.mxu0 %v869_v8  ;;  %v873_v25 = vld [vmem:[%s1071_s1 + $0x48] sm:$0xff]  ;;  %v872_v29 = vld [vmem:[%s1071_s1 + $0x40] sm:$0xff]  ;;  %v717_v35 = vld [vmem:[%s209_s26 + $0x10] sm:$0xf0] }
  0x15   : > { %521 = vmatpush.bf16.msra.mxu1 %v877_v9  ;;  %v881_v26 = vld [vmem:[%s1071_s1 + $0x88] sm:$0xff]  ;;  %v880_v30 = vld [vmem:[%s1071_s1 + $0x80] sm:$0xff]  ;;  %v863_v37 = vld [vmem:[%s209_s26 + $0x14] sm:$0xf0] }
  0x16   : > { %535 = vmatpush.bf16.msra.mxu2 %v885_v10  ;;  %v889_v27 = vld [vmem:[%s1071_s1 + $0xc8] sm:$0xff]  ;;  %v888_v31 = vld [vmem:[%s1071_s1 + $0xc0] sm:$0xff]  ;;  %v725_v39 = vld [vmem:[%s209_s26 + $0x18] sm:$0xf0] }
  0x17   : > { %549 = vmatpush.bf16.msra.mxu3 %v893_v11  ;;  %v715_v32 = vld [vmem:[%s209_s26] sm:$0xf]  ;;  %v860_v34 = vld [vmem:[%s209_s26 + $0x4] sm:$0xf]  ;;  %v723_v36 = vld [vmem:[%s209_s26 + $0x8] sm:$0xf] }
  0x18   : > { %508 = vmatpush.bf16.msra.mxu0 %v868_v12  ;;  %v861_v38 = vld [vmem:[%s209_s26 + $0xc] sm:$0xf]  ;;  %v716_v40 = vor.u32 %v862_v33, %v715_v32  ;;  %v720_v41 = vor.u32 %v860_v34, %v717_v35  ;;  %v724_v42 = vor.u32 %v863_v37, %v723_v36 }
  0x19   : > { %522 = vmatpush.bf16.msra.mxu1 %v876_v13  ;;  %v728_v43 = vor.u32 %v861_v38, %v725_v39 }
  0x1a   : > { %536 = vmatpush.bf16.msra.mxu2 %v884_v14 }
  0x1b   : > { %550 = vmatpush.bf16.msra.mxu3 %v892_v15 }
  0x1c   : > { %509 = vmatpush.bf16.msra.mxu0 %v867_v16 }
  0x1d   : > { %523 = vmatpush.bf16.msra.mxu1 %v875_v17 }
  0x1e   : > { %537 = vmatpush.bf16.msra.mxu2 %v883_v18 }
  0x1f   : > { %551 = vmatpush.bf16.msra.mxu3 %v891_v19 }
  0x20   : > { %510 = vmatpush.bf16.msra.mxu0 %v866_v20 }
  0x21   : > { %524 = vmatpush.bf16.msra.mxu1 %v874_v21 }
  0x22   : > { %538 = vmatpush.bf16.msra.mxu2 %v882_v22 }
  0x23   : > { %552 = vmatpush.bf16.msra.mxu3 %v890_v23 }
  0x24   : > { %511 = vmatpush.bf16.msra.mxu0 %v865_v24 }
  0x25   : > { %525 = vmatpush.bf16.msra.mxu1 %v873_v25 }
  0x26   : > { %539 = vmatpush.bf16.msra.mxu2 %v881_v26 }
  0x27   : > { %553 = vmatpush.bf16.msra.mxu3 %v889_v27 }
  0x28   : > { %512 = vmatpush.bf16.msra.mxu0 %v864_v28 }
  0x29   : > { %526 = vmatpush.bf16.msra.mxu1 %v872_v29 }
  0x2a   : > { %540 = vmatpush.bf16.msra.mxu2 %v880_v30 }
  0x2b   : > { %554 = vmatpush.bf16.msra.mxu3 %v888_v31  ;;  %513 = vmatmul.bf16.vlgmr.msra.gmra.mxu0 %v716_v40 }
  0x2c   : > { %527 = vmatmul.bf16.vlgmr.msra.gmra.mxu1 %v720_v41 }
  0x2d   : > { %541 = vmatmul.bf16.vlgmr.msra.gmra.mxu2 %v724_v42 }
  0x2e   : > { %555 = vmatmul.bf16.vlgmr.msra.gmra.mxu3 %v728_v43 }
  0xa8   : > { %v514_v44 = vpop.f32.mrf.mxu0 }
  0xa9   : > { %v528_v45 = vpop.f32.mrf.mxu1 }
  0xaa   : > { %v529_v48 = vadd.f32 %v528_v45, %v514_v44 }
  0xb0   : > { %v542_v46 = vpop.f32.mrf.mxu2  ;;  %v516_v49 = vpop.f32.mrf.mxu0 }
  0xb1   : > { %v556_v47 = vpop.f32.mrf.mxu3  ;;  %v530_v50 = vpop.f32.mrf.mxu1  ;;  %v543_v51 = vadd.f32 %v542_v46, %v529_v48 }
  0xb2   : > { %v531_v52 = vadd.f32 %v530_v50, %v516_v49 }
  0xb3   : > { %v557_v54 = vadd.f32 %v556_v47, %v543_v51 }
  0xb5   : > { %v572_v58 = vmul.f32 %v557_v54, %v557_v54 }
  0xb8   : > { %v544_v53 = vpop.f32.mrf.mxu2 }
  0xb9   : > { %v545_v55 = vadd.f32 %v544_v53, %v531_v52  ;;  %v558_v56 = vpop.f32.mrf.mxu3 }
  0xbb   : > { %v559_v57 = vadd.f32 %v558_v56, %v545_v55 }
  0xbd   : > { %v899_v59 = vpack.c.bf16 %v559_v57, %v557_v54  ;;  %v565_v60 = vadd.f32 %v559_v57, %v557_v54  ;;  %v573_v61 = vmul.f32 %v559_v57, %v559_v57 }
  0xbf   : > { %900 = vst [vmem:[%s215_s19] sm:$0xff] %v899_v59   ;;  %v566_v62 = vrot.slane %v565_v60, 4  ;;  %v574_v63 = vadd.f32 %v573_v61, %v572_v58 }
  0xc1   : > { %v567_v0 = vadd.f32 %v566_v62, %v565_v60  ;;  %v575_v1 = vrot.slane %v574_v63, 4 }
  0xc3   : > { %v568_v2 = vrot.slane %v567_v0, 2  ;;  %v576_v3 = vadd.f32 %v575_v1, %v574_v63 }
  0xc5   : > { %v569_v4 = vadd.f32 %v568_v2, %v567_v0  ;;  %v577_v5 = vrot.slane %v576_v3, 2 }
  0xc7   : > { %v570_v6 = vrot.slane %v569_v4, 1  ;;  %v578_v7 = vadd.f32 %v577_v5, %v576_v3 }
  0xc9   : > { %v571_v8 = vadd.f32 %v570_v6, %v569_v4  ;;  %v579_v9 = vrot.slane %v578_v7, 1 }
  0xcb   : > { %v580_v10 = vadd.f32 %v579_v9, %v578_v7  ;;  %581 = vst [vmem:[%s220_s22] sm:$0xff] %v571_v8 }
  0xcd   : > { %582 = vst [vmem:[%s224_s25] sm:$0xff] %v580_v10 }
  0xce PF: > { %s15_s15 = sadd.s32 1, %s915_s15  }
  0xcf   : > { %p12_p5 = scmp.ge.s32.totalorder %s15_s15, 4  }
  0xd1   :  { %14 = sbr.rel (!%p12_p5) target bundleno = 1 (0x1), region = 82 }

</bundles_post_ra>
